<compile_context>
chip_gen: v7x
topology: tpu7x:2x2x1
jax: 0.10.0
libtpu: 0.0.40
codegen_flags: <defaults>
</compile_context>

<pallas_src>
import numpy as np
import jax
import jax.numpy as jnp
from jax.experimental import pallas as pl
from jax.experimental.pallas import tpu as pltpu

HIDDEN = 64
GATES = 4 * HIDDEN          # 256 fused gate lanes: [ i | f | c | o ]
IN_PAD = HIDDEN             # node features zero-padded to 64 so [h_dst | x] is 128-wide
PRED_HID = 32
PRED_PAD = 128              # lane-dense predictor output slab width
EPS_GN = 1e-5


def _round_up(n, m):
    return ((n + m - 1) // m) * m


# ----------------------------- Pallas kernels ------------------------------

def _cell_graphnorm(a, h_src, hx, c_prev, msk_scaled,
                    wl, wrx, b, wci, wcf, wco, gnw, gnb, gnms):
    """HeteroGCLSTM cell + masked GraphNorm for one node type (one grid step)."""
    # Mean aggregation (shared by all four gates), bf16 MXU inputs, f32 accumulation.
    agg = jnp.dot(a.astype(jnp.bfloat16), h_src.astype(jnp.bfloat16),
                  preferred_element_type=jnp.float32)                    # [N, 64]
    # Fused pre-activations for all four gates:
    #   lin_l(agg) + [h_dst | x] @ [Wr ; Wx] + (b_gate + b_lin_l)
    pre = (jnp.dot(agg.astype(jnp.bfloat16), wl, preferred_element_type=jnp.float32)
           + jnp.dot(hx.astype(jnp.bfloat16), wrx, preferred_element_type=jnp.float32)
           + b)                                                          # [N, 256]

    i = jax.nn.sigmoid(pre[:, 0 * HIDDEN:1 * HIDDEN] + wci * c_prev)
    f = jax.nn.sigmoid(pre[:, 1 * HIDDEN:2 * HIDDEN] + wcf * c_prev)
    g = jnp.tanh(pre[:, 2 * HIDDEN:3 * HIDDEN])
    c_new = f * c_prev + i * g
    o = jax.nn.sigmoid(pre[:, 3 * HIDDEN:4 * HIDDEN] + wco * c_new)
    h_new = o * jnp.tanh(c_new)

    # GraphNorm with padded rows masked out of the statistics.
    # msk_scaled[row] = 1/num_valid for valid rows, 0 for padding rows.
    mean = jnp.sum(h_new * msk_scaled, axis=0, keepdims=True)
    centered = h_new - mean * gnms
    var = jnp.sum(centered * centered * msk_scaled, axis=0, keepdims=True)
    h_norm = gnw * centered * jax.lax.rsqrt(var + EPS_GN) + gnb
    return h_norm, c_new


def _fused_layer_kernel(a_ref, hsrc_ref, hx_ref, c_ref, msk_ref,
                        wl_ref, wrx_ref, b_ref, wci_ref, wcf_ref, wco_ref,
                        gnw_ref, gnb_ref, gnms_ref,
                        hc_ref):
    h_norm, c_new = _cell_graphnorm(
        a_ref[0], hsrc_ref[0], hx_ref[0], c_ref[0], msk_ref[0],
        wl_ref[0], wrx_ref[0], b_ref[0],
        wci_ref[0], wcf_ref[0], wco_ref[0],
        gnw_ref[0], gnb_ref[0], gnms_ref[0])
    # Lane-dense [N, 128] packed output slab: h in lanes 0:64, c in lanes 64:128.
    hc_ref[0] = jnp.concatenate([h_norm, c_new], axis=-1)


def _fused_layer_pred_kernel(a_ref, hsrc_ref, hx_ref, c_ref, msk_ref,
                             wl_ref, wrx_ref, b_ref, wci_ref, wcf_ref, wco_ref,
                             gnw_ref, gnb_ref, gnms_ref,
                             pw1_ref, pb1_ref, pw2_ref, pb2_ref,
                             hc_ref, pred_ref):
    h_norm, c_new = _cell_graphnorm(
        a_ref[0], hsrc_ref[0], hx_ref[0], c_ref[0], msk_ref[0],
        wl_ref[0], wrx_ref[0], b_ref[0],
        wci_ref[0], wcf_ref[0], wco_ref[0],
        gnw_ref[0], gnb_ref[0], gnms_ref[0])
    hc_ref[0] = jnp.concatenate([h_norm, c_new], axis=-1)
    # MLP predictor epilogue (runs on both node types; only the customer slab is used).
    hid = jnp.maximum(
        jnp.dot(h_norm, pw1_ref[...], preferred_element_type=jnp.float32) + pb1_ref[...],
        0.0)
    pred_ref[0] = (jnp.dot(hid, pw2_ref[...], preferred_element_type=jnp.float32)
                   + pb2_ref[...])


def _layer_in_specs(n_pad, with_predictor):
    per_type = lambda d: pl.BlockSpec((1, n_pad, d), lambda t: (t, 0, 0))
    specs = [
        per_type(n_pad),                                             # A
        per_type(HIDDEN),                                            # h_src
        per_type(2 * HIDDEN),                                        # [h_dst | x_pad]
        per_type(HIDDEN),                                            # c_prev
        per_type(1),                                                 # mask / n_valid
        pl.BlockSpec((1, HIDDEN, GATES), lambda t: (t, 0, 0)),       # Wl (bf16)
        pl.BlockSpec((1, 2 * HIDDEN, GATES), lambda t: (t, 0, 0)),   # Wrx (bf16)
        pl.BlockSpec((1, 1, GATES), lambda t: (t, 0, 0)),            # fused bias
        pl.BlockSpec((1, 1, HIDDEN), lambda t: (t, 0, 0)),           # w_c_i
        pl.BlockSpec((1, 1, HIDDEN), lambda t: (t, 0, 0)),           # w_c_f
        pl.BlockSpec((1, 1, HIDDEN), lambda t: (t, 0, 0)),           # w_c_o
        pl.BlockSpec((1, 1, HIDDEN), lambda t: (t, 0, 0)),           # gn weight
        pl.BlockSpec((1, 1, HIDDEN), lambda t: (t, 0, 0)),           # gn bias
        pl.BlockSpec((1, 1, HIDDEN), lambda t: (t, 0, 0)),           # gn mean_scale
    ]
    if with_predictor:
        specs += [
            pl.BlockSpec((HIDDEN, PRED_HID), lambda t: (0, 0)),      # pred_w1
            pl.BlockSpec((1, PRED_HID), lambda t: (0, 0)),           # pred_b1
            pl.BlockSpec((PRED_HID, PRED_PAD), lambda t: (0, 0)),    # pred_w2 (padded)
            pl.BlockSpec((1, PRED_PAD), lambda t: (0, 0)),           # pred_b2 (padded)
        ]
    return specs


def fused_hetero_layer(A_stack, h_src_stack, hx_stack, c_stack, mask_stack, lp):
    """One HeteroGCLSTM step + GraphNorm for BOTH node types in a single pallas_call."""
    n_pad = A_stack.shape[1]
    return pl.pallas_call(
        _fused_layer_kernel,
        out_shape=jax.ShapeDtypeStruct((2, n_pad, 2 * HIDDEN), jnp.float32),
        grid=(2,),
        in_specs=_layer_in_specs(n_pad, with_predictor=False),
        out_specs=pl.BlockSpec((1, n_pad, 2 * HIDDEN), lambda t: (t, 0, 0)),
        compiler_params=pltpu.CompilerParams(dimension_semantics=("parallel",)),
    )(A_stack, h_src_stack, hx_stack, c_stack, mask_stack,
      lp['Wl'], lp['Wrx'], lp['b'], lp['wci'], lp['wcf'], lp['wco'],
      lp['gnw'], lp['gnb'], lp['gnms'])


def fused_hetero_layer_with_predictor(A_stack, h_src_stack, hx_stack, c_stack,
                                      mask_stack, lp, pw1, pb1, pw2_pad, pb2_pad):
    """Last layer: cell + GraphNorm for both node types + MLP predictor, fused."""
    n_pad = A_stack.shape[1]
    return pl.pallas_call(
        _fused_layer_pred_kernel,
        out_shape=(jax.ShapeDtypeStruct((2, n_pad, 2 * HIDDEN), jnp.float32),
                   jax.ShapeDtypeStruct((2, n_pad, PRED_PAD), jnp.float32)),
        grid=(2,),
        in_specs=_layer_in_specs(n_pad, with_predictor=True),
        out_specs=(pl.BlockSpec((1, n_pad, 2 * HIDDEN), lambda t: (t, 0, 0)),
                   pl.BlockSpec((1, n_pad, PRED_PAD), lambda t: (t, 0, 0))),
        compiler_params=pltpu.CompilerParams(dimension_semantics=("parallel",)),
    )(A_stack, h_src_stack, hx_stack, c_stack, mask_stack,
      lp['Wl'], lp['Wrx'], lp['b'], lp['wci'], lp['wcf'], lp['wco'],
      lp['gnw'], lp['gnb'], lp['gnms'],
      pw1, pb1, pw2_pad, pb2_pad)


# ------------------------------- glue (JAX) --------------------------------

def mean_adjacency(src_idx, dst_idx, n_src, n_dst):
    """Dense mean-aggregation matrix A so that A @ x_src == scatter-mean over edges."""
    A = jnp.zeros((n_dst, n_src), jnp.float32).at[dst_idx, src_idx].add(1.0)
    deg = A.sum(axis=1, keepdims=True)
    return jnp.where(deg > 0, A / jnp.maximum(deg, 1.0), 0.0)


def init_params(key, num_countries=10, country_dim=4, num_descs=20, desc_dim=16,
                num_layers=1):
    customer_in = 14 + country_dim       # 18
    product_in = 4 + desc_dim            # 20
    keys = iter(jax.random.split(key, 256))

    def rnd(shape, scale=0.1):
        return (scale * jax.random.normal(next(keys), shape)).astype(jnp.float32)

    params = {
        'country_embed': rnd((num_countries, country_dim), 1.0),
        'desc_embed': rnd((num_descs, desc_dim), 1.0),
        'gnn': [], 'gn_customer': [], 'gn_product': [],
    }
    in_dims = {'customer': customer_in, 'product': product_in}
    for layer in range(num_layers):
        if layer > 0:
            in_dims = {'customer': HIDDEN, 'product': HIDDEN}
        layer_p = {}
        for nt in ('customer', 'product'):
            p = {}
            for g in ('i', 'f', 'c', 'o'):
                p[f'W_{g}'] = rnd((in_dims[nt], HIDDEN))
                p[f'b_{g}'] = rnd((1, HIDDEN))
                if g != 'c':
                    p[f'w_c_{g}'] = rnd((1, HIDDEN))
                # SAGEConv (single edge type whose dst node type is `nt`)
                p[f'conv_{g}_wl'] = rnd((HIDDEN, HIDDEN))   # lin_l.weight.T
                p[f'conv_{g}_bl'] = rnd((1, HIDDEN))        # lin_l.bias
                p[f'conv_{g}_wr'] = rnd((HIDDEN, HIDDEN))   # lin_r.weight.T (no bias)
            layer_p[nt] = p
        params['gnn'].append(layer_p)
        for name in ('gn_customer', 'gn_product'):
            params[name].append({'weight': jnp.ones((1, HIDDEN), jnp.float32),
                                 'bias': jnp.zeros((1, HIDDEN), jnp.float32),
                                 'mean_scale': jnp.ones((1, HIDDEN), jnp.float32)})
    params['pred_w1'] = rnd((HIDDEN, PRED_HID))
    params['pred_b1'] = rnd((1, PRED_HID))
    params['pred_w2'] = rnd((PRED_HID, 1))
    params['pred_b2'] = rnd((1, 1))
    return params


def prepare_fused_params(params, num_layers=1):
    """One-time algebraic fusion + bf16 pre-cast + node-type stacking of the weights."""
    country_dim = params['country_embed'].shape[1]
    desc_dim = params['desc_embed'].shape[1]

    def fuse_type(p, in_dim):
        assert in_dim <= IN_PAD
        def cat(fmt):
            return jnp.concatenate([p[fmt.format(g)] for g in ('i', 'f', 'c', 'o')], axis=1)
        Wl = cat('conv_{}_wl')                                            # [64, 256]
        Wr = cat('conv_{}_wr')                                            # [64, 256]
        Wx = cat('W_{}')                                                  # [in, 256]
        Wx_pad = jnp.zeros((IN_PAD, GATES), jnp.float32).at[:in_dim].set(Wx)
        Wrx = jnp.concatenate([Wr, Wx_pad], axis=0)                       # [128, 256]
        b = cat('b_{}') + cat('conv_{}_bl')                               # [1, 256]
        return Wl, Wrx, b, p['w_c_i'], p['w_c_f'], p['w_c_o']

    fused = {
        'country_embed': params['country_embed'],
        'desc_embed': params['desc_embed'],
        'layers': [],
        'pred_w1': params['pred_w1'],
        'pred_b1': params['pred_b1'],
        # zero-pad the final linear to a lane-dense 128-wide output slab
        'pred_w2_pad': jnp.pad(params['pred_w2'], ((0, 0), (0, PRED_PAD - 1))),
        'pred_b2_pad': jnp.pad(params['pred_b2'], ((0, 0), (0, PRED_PAD - 1))),
    }
    for layer in range(num_layers):
        lp = params['gnn'][layer]
        in_c = (14 + country_dim) if layer == 0 else HIDDEN
        in_p = (4 + desc_dim) if layer == 0 else HIDDEN
        cWl, cWrx, cb, cwi, cwf, cwo = fuse_type(lp['customer'], in_c)
        pWl, pWrx, pb, pwi, pwf, pwo = fuse_type(lp['product'], in_p)
        gc, gp_ = params['gn_customer'][layer], params['gn_product'][layer]
        fused['layers'].append({
            # matmul weights stored bf16 once (halves weight DMA)
            'Wl': jnp.stack([cWl, pWl]).astype(jnp.bfloat16),             # [2, 64, 256]
            'Wrx': jnp.stack([cWrx, pWrx]).astype(jnp.bfloat16),          # [2, 128, 256]
            'b': jnp.stack([cb, pb]),                                     # [2, 1, 256]
            'wci': jnp.stack([cwi, pwi]),
            'wcf': jnp.stack([cwf, pwf]),
            'wco': jnp.stack([cwo, pwo]),
            'gnw': jnp.stack([gc['weight'], gp_['weight']]),
            'gnb': jnp.stack([gc['bias'], gp_['bias']]),
            'gnms': jnp.stack([gc['mean_scale'], gp_['mean_scale']]),
        })
    return fused


def clv_forward(fp, customer_feats, product_feats,
                A_cust_from_prod, A_prod_from_cust,
                h_dict=None, c_dict=None, num_layers=1):
    # ----- embedding + concat (glue) -----
    country_ids = customer_feats[:, -1].astype(jnp.int32)
    customer_x = jnp.concatenate(
        [customer_feats[:, :-1], jnp.take(fp['country_embed'], country_ids, axis=0)], axis=1)
    desc_ids = product_feats[:, -1].astype(jnp.int32)
    product_x = jnp.concatenate(
        [product_feats[:, :-1], jnp.take(fp['desc_embed'], desc_ids, axis=0)], axis=1)

    Nc, Np = customer_x.shape[0], product_x.shape[0]
    n_pad = max(_round_up(Nc, 8), _round_up(Np, 8))

    # ----- stacked, sublane-padded per-node-type tensors (idx 0=customer, 1=product) --
    A_stack = (jnp.zeros((2, n_pad, n_pad), jnp.float32)
               .at[0, :Nc, :Np].set(A_cust_from_prod)
               .at[1, :Np, :Nc].set(A_prod_from_cust))
    # GraphNorm mask: 1/num_valid for real rows, 0 for padding rows
    mask_stack = (jnp.zeros((2, n_pad, 1), jnp.float32)
                  .at[0, :Nc].set(1.0 / Nc)
                  .at[1, :Np].set(1.0 / Np))

    def pad_feat(x):
        return jnp.zeros((n_pad, IN_PAD), jnp.float32).at[:x.shape[0], :x.shape[1]].set(x)

    def pad_rows(x):
        return jnp.zeros((n_pad, HIDDEN), jnp.float32).at[:x.shape[0]].set(x)

    x_stack = jnp.stack([pad_feat(customer_x), pad_feat(product_x)])      # [2, n_pad, 64]
    if h_dict is None:
        h_stack = jnp.zeros((2, n_pad, HIDDEN), jnp.float32)
    else:
        h_stack = jnp.stack([pad_rows(h_dict['customer']), pad_rows(h_dict['product'])])
    if c_dict is None:
        c_stack = jnp.zeros((2, n_pad, HIDDEN), jnp.float32)
    else:
        c_stack = jnp.stack([pad_rows(c_dict['customer']), pad_rows(c_dict['product'])])

    preds_pad = None
    for layer in range(num_layers):
        lp = fp['layers'][layer]
        # customer aggregates the OLD product hidden state and vice versa
        h_src_stack = h_stack[::-1]
        hx_stack = jnp.concatenate([h_stack, x_stack], axis=-1)           # [2, n_pad, 128]
        if layer == num_layers - 1:
            hc_stack, preds_pad = fused_hetero_layer_with_predictor(
                A_stack, h_src_stack, hx_stack, c_stack, mask_stack, lp,
                fp['pred_w1'], fp['pred_b1'], fp['pred_w2_pad'], fp['pred_b2_pad'])
        else:
            hc_stack = fused_hetero_layer(
                A_stack, h_src_stack, hx_stack, c_stack, mask_stack, lp)
        h_stack = hc_stack[:, :, :HIDDEN]
        c_stack = hc_stack[:, :, HIDDEN:]
        x_stack = h_stack                 # processed_x = h_dict for deeper layers

    preds = preds_pad[0, :Nc, :1]         # column 0 of customer's lane-dense pred slab
    h_out = {'customer': h_stack[0, :Nc], 'product': h_stack[1, :Np]}
    c_out = {'customer': c_stack[0, :Nc], 'product': c_stack[1, :Np]}
    return preds, h_out, c_out


# --------------------------------- main -------------------------------------

if __name__ == "__main__":
    key = jax.random.PRNGKey(0)
    k1, k2, k3, k4, k5 = jax.random.split(key, 5)

    Nc, Np = 16, 12
    num_countries, num_descs = 10, 20

    cust_num = jax.random.normal(k1, (Nc, 14), jnp.float32)
    cust_country = jax.random.randint(k2, (Nc, 1), 0, num_countries).astype(jnp.float32)
    customer_feats = jnp.concatenate([cust_num, cust_country], axis=1)        # [Nc, 15]

    prod_num = jax.random.normal(k3, (Np, 4), jnp.float32)
    prod_desc = jax.random.randint(k4, (Np, 1), 0, num_descs).astype(jnp.float32)
    product_feats = jnp.concatenate([prod_num, prod_desc], axis=1)            # [Np, 5]

    # deterministic bipartite edges: ('customer','buys','product') and its reverse
    src = np.repeat(np.arange(Nc), 3)
    dst = np.array([(c * 5 + j * 7) % Np for c in range(Nc) for j in range(3)])
    buys_src = jnp.asarray(src, jnp.int32)
    buys_dst = jnp.asarray(dst, jnp.int32)

    A_prod_from_cust = mean_adjacency(buys_src, buys_dst, Nc, Np)  # dst=product, src=customer
    A_cust_from_prod = mean_adjacency(buys_dst, buys_src, Np, Nc)  # dst=customer, src=product

    params = init_params(k5, num_countries=num_countries, num_descs=num_descs, num_layers=1)
    fused_params = prepare_fused_params(params, num_layers=1)

    preds, h_dict, c_dict = clv_forward(fused_params, customer_feats, product_feats,
                                        A_cust_from_prod, A_prod_from_cust, num_layers=1)
    jax.block_until_ready((preds, h_dict, c_dict))

    assert preds.shape == (Nc, 1)
    assert h_dict['customer'].shape == (Nc, HIDDEN)
    assert h_dict['product'].shape == (Np, HIDDEN)
    assert c_dict['customer'].shape == (Nc, HIDDEN)
    assert c_dict['product'].shape == (Np, HIDDEN)
    print("KERNEL_OK")
</pallas_src>

<mosaic_0001>
module attributes {stable_mosaic.version = 11 : i64} {
  func.func @_fused_layer_pred_kernel(%arg0: i32, %arg1: memref<1x16x16xf32, #tpu.memory_space<vmem>>, %arg2: memref<1x16x64xf32, #tpu.memory_space<vmem>>, %arg3: memref<1x16x128xf32, #tpu.memory_space<vmem>>, %arg4: memref<1x16x64xf32, #tpu.memory_space<vmem>>, %arg5: memref<1x16x1xf32, #tpu.memory_space<vmem>>, %arg6: memref<1x64x256xbf16, #tpu.memory_space<vmem>>, %arg7: memref<1x128x256xbf16, #tpu.memory_space<vmem>>, %arg8: memref<1x1x256xf32, #tpu.memory_space<vmem>>, %arg9: memref<1x1x64xf32, #tpu.memory_space<vmem>>, %arg10: memref<1x1x64xf32, #tpu.memory_space<vmem>>, %arg11: memref<1x1x64xf32, #tpu.memory_space<vmem>>, %arg12: memref<1x1x64xf32, #tpu.memory_space<vmem>>, %arg13: memref<1x1x64xf32, #tpu.memory_space<vmem>>, %arg14: memref<1x1x64xf32, #tpu.memory_space<vmem>>, %arg15: memref<64x32xf32, #tpu.memory_space<vmem>>, %arg16: memref<1x32xf32, #tpu.memory_space<vmem>>, %arg17: memref<32x128xf32, #tpu.memory_space<vmem>>, %arg18: memref<1x128xf32, #tpu.memory_space<vmem>>, %arg19: memref<1x16x128xf32, #tpu.memory_space<vmem>>, %arg20: memref<1x16x128xf32, #tpu.memory_space<vmem>>) attributes {dimension_semantics = [#tpu.dimension_semantics<parallel>], iteration_bounds = array<i64: 2>, scalar_prefetch = 0 : i64, scratch_operands = 0 : i64, tpu.core_type = #tpu.core_type<tc>, window_params = [{transform_indices = @transform_0, window_bounds = array<i64: 1, 16, 16>}, {transform_indices = @transform_1, window_bounds = array<i64: 1, 16, 64>}, {transform_indices = @transform_2, window_bounds = array<i64: 1, 16, 128>}, {transform_indices = @transform_3, window_bounds = array<i64: 1, 16, 64>}, {transform_indices = @transform_4, window_bounds = array<i64: 1, 16, 1>}, {transform_indices = @transform_5, window_bounds = array<i64: 1, 64, 256>}, {transform_indices = @transform_6, window_bounds = array<i64: 1, 128, 256>}, {transform_indices = @transform_7, window_bounds = array<i64: 1, 1, 256>}, {transform_indices = @transform_8, window_bounds = array<i64: 1, 1, 64>}, {transform_indices = @transform_9, window_bounds = array<i64: 1, 1, 64>}, {transform_indices = @transform_10, window_bounds = array<i64: 1, 1, 64>}, {transform_indices = @transform_11, window_bounds = array<i64: 1, 1, 64>}, {transform_indices = @transform_12, window_bounds = array<i64: 1, 1, 64>}, {transform_indices = @transform_13, window_bounds = array<i64: 1, 1, 64>}, {pipeline_mode = #tpu.pipeline_mode<synchronous>, transform_indices = @transform_14, window_bounds = array<i64: 64, 32>}, {pipeline_mode = #tpu.pipeline_mode<synchronous>, transform_indices = @transform_15, window_bounds = array<i64: 1, 32>}, {pipeline_mode = #tpu.pipeline_mode<synchronous>, transform_indices = @transform_16, window_bounds = array<i64: 32, 128>}, {pipeline_mode = #tpu.pipeline_mode<synchronous>, transform_indices = @transform_17, window_bounds = array<i64: 1, 128>}, {transform_indices = @transform_18, window_bounds = array<i64: 1, 16, 128>}, {transform_indices = @transform_19, window_bounds = array<i64: 1, 16, 128>}]} {
    %c0 = arith.constant 0 : index
    %c0_0 = arith.constant 0 : index
    %c0_1 = arith.constant 0 : index
    %0 = vector.load %arg1[%c0, %c0_0, %c0_1] : memref<1x16x16xf32, #tpu.memory_space<vmem>>, vector<1x16x16xf32>
    %1 = vector.shape_cast %0 : vector<1x16x16xf32> to vector<16x16xf32>
    %c0_2 = arith.constant 0 : index
    %c0_3 = arith.constant 0 : index
    %c0_4 = arith.constant 0 : index
    %2 = vector.load %arg2[%c0_2, %c0_3, %c0_4] : memref<1x16x64xf32, #tpu.memory_space<vmem>>, vector<1x16x64xf32>
    %3 = vector.shape_cast %2 : vector<1x16x64xf32> to vector<16x64xf32>
    %c0_5 = arith.constant 0 : index
    %c0_6 = arith.constant 0 : index
    %c0_7 = arith.constant 0 : index
    %4 = vector.load %arg3[%c0_5, %c0_6, %c0_7] : memref<1x16x128xf32, #tpu.memory_space<vmem>>, vector<1x16x128xf32>
    %5 = vector.shape_cast %4 : vector<1x16x128xf32> to vector<16x128xf32>
    %c0_8 = arith.constant 0 : index
    %c0_9 = arith.constant 0 : index
    %c0_10 = arith.constant 0 : index
    %6 = vector.load %arg4[%c0_8, %c0_9, %c0_10] : memref<1x16x64xf32, #tpu.memory_space<vmem>>, vector<1x16x64xf32>
    %7 = vector.shape_cast %6 : vector<1x16x64xf32> to vector<16x64xf32>
    %c0_11 = arith.constant 0 : index
    %c0_12 = arith.constant 0 : index
    %c0_13 = arith.constant 0 : index
    %8 = vector.load %arg5[%c0_11, %c0_12, %c0_13] : memref<1x16x1xf32, #tpu.memory_space<vmem>>, vector<1x16x1xf32>
    %9 = vector.shape_cast %8 : vector<1x16x1xf32> to vector<16x1xf32>
    %c0_14 = arith.constant 0 : index
    %c0_15 = arith.constant 0 : index
    %c0_16 = arith.constant 0 : index
    %10 = vector.load %arg6[%c0_14, %c0_15, %c0_16] : memref<1x64x256xbf16, #tpu.memory_space<vmem>>, vector<1x64x256xbf16>
    %11 = vector.shape_cast %10 : vector<1x64x256xbf16> to vector<64x256xbf16>
    %c0_17 = arith.constant 0 : index
    %c0_18 = arith.constant 0 : index
    %c0_19 = arith.constant 0 : index
    %12 = vector.load %arg7[%c0_17, %c0_18, %c0_19] : memref<1x128x256xbf16, #tpu.memory_space<vmem>>, vector<1x128x256xbf16>
    %13 = vector.shape_cast %12 : vector<1x128x256xbf16> to vector<128x256xbf16>
    %c0_20 = arith.constant 0 : index
    %c0_21 = arith.constant 0 : index
    %c0_22 = arith.constant 0 : index
    %14 = vector.load %arg8[%c0_20, %c0_21, %c0_22] : memref<1x1x256xf32, #tpu.memory_space<vmem>>, vector<1x1x256xf32>
    %15 = vector.shape_cast %14 : vector<1x1x256xf32> to vector<1x256xf32>
    %c0_23 = arith.constant 0 : index
    %c0_24 = arith.constant 0 : index
    %c0_25 = arith.constant 0 : index
    %16 = vector.load %arg9[%c0_23, %c0_24, %c0_25] : memref<1x1x64xf32, #tpu.memory_space<vmem>>, vector<1x1x64xf32>
    %17 = vector.shape_cast %16 : vector<1x1x64xf32> to vector<1x64xf32>
    %c0_26 = arith.constant 0 : index
    %c0_27 = arith.constant 0 : index
    %c0_28 = arith.constant 0 : index
    %18 = vector.load %arg10[%c0_26, %c0_27, %c0_28] : memref<1x1x64xf32, #tpu.memory_space<vmem>>, vector<1x1x64xf32>
    %19 = vector.shape_cast %18 : vector<1x1x64xf32> to vector<1x64xf32>
    %c0_29 = arith.constant 0 : index
    %c0_30 = arith.constant 0 : index
    %c0_31 = arith.constant 0 : index
    %20 = vector.load %arg11[%c0_29, %c0_30, %c0_31] : memref<1x1x64xf32, #tpu.memory_space<vmem>>, vector<1x1x64xf32>
    %21 = vector.shape_cast %20 : vector<1x1x64xf32> to vector<1x64xf32>
    %c0_32 = arith.constant 0 : index
    %c0_33 = arith.constant 0 : index
    %c0_34 = arith.constant 0 : index
    %22 = vector.load %arg12[%c0_32, %c0_33, %c0_34] : memref<1x1x64xf32, #tpu.memory_space<vmem>>, vector<1x1x64xf32>
    %23 = vector.shape_cast %22 : vector<1x1x64xf32> to vector<1x64xf32>
    %c0_35 = arith.constant 0 : index
    %c0_36 = arith.constant 0 : index
    %c0_37 = arith.constant 0 : index
    %24 = vector.load %arg13[%c0_35, %c0_36, %c0_37] : memref<1x1x64xf32, #tpu.memory_space<vmem>>, vector<1x1x64xf32>
    %25 = vector.shape_cast %24 : vector<1x1x64xf32> to vector<1x64xf32>
    %c0_38 = arith.constant 0 : index
    %c0_39 = arith.constant 0 : index
    %c0_40 = arith.constant 0 : index
    %26 = vector.load %arg14[%c0_38, %c0_39, %c0_40] : memref<1x1x64xf32, #tpu.memory_space<vmem>>, vector<1x1x64xf32>
    %27 = vector.shape_cast %26 : vector<1x1x64xf32> to vector<1x64xf32>
    %28 = arith.truncf %1 : vector<16x16xf32> to vector<16x16xbf16>
    %29 = arith.truncf %3 : vector<16x64xf32> to vector<16x64xbf16>
    %cst = arith.constant dense<0.000000e+00> : vector<16x64xf32>
    %30 = tpu.matmul %28, %29, %cst {dimension_numbers = #tpu.dot_dimension_numbers<[1], [0], [0], [1], [0, 0, 1, 1], [], []>} : vector<16x16xbf16>, vector<16x64xbf16>, vector<16x64xf32> -> vector<16x64xf32>
    %31 = arith.truncf %30 : vector<16x64xf32> to vector<16x64xbf16>
    %cst_41 = arith.constant dense<0.000000e+00> : vector<16x256xf32>
    %32 = tpu.matmul %31, %11, %cst_41 {dimension_numbers = #tpu.dot_dimension_numbers<[1], [0], [0], [1], [0, 0, 1, 1], [], []>} : vector<16x64xbf16>, vector<64x256xbf16>, vector<16x256xf32> -> vector<16x256xf32>
    %33 = arith.truncf %5 : vector<16x128xf32> to vector<16x128xbf16>
    %cst_42 = arith.constant dense<0.000000e+00> : vector<16x256xf32>
    %34 = tpu.matmul %33, %13, %cst_42 {dimension_numbers = #tpu.dot_dimension_numbers<[1], [0], [0], [1], [0, 0, 1, 1], [], []>} : vector<16x128xbf16>, vector<128x256xbf16>, vector<16x256xf32> -> vector<16x256xf32>
    %35 = arith.addf %32, %34 : vector<16x256xf32>
    %36 = vector.broadcast %15 : vector<1x256xf32> to vector<16x256xf32>
    %37 = arith.addf %35, %36 : vector<16x256xf32>
    %38 = vector.extract_strided_slice %37 {offsets = [0, 0], sizes = [16, 64], strides = [1, 1]} : vector<16x256xf32> to vector<16x64xf32>
    %39 = vector.broadcast %17 : vector<1x64xf32> to vector<16x64xf32>
    %40 = arith.mulf %39, %7 : vector<16x64xf32>
    %41 = arith.addf %38, %40 : vector<16x64xf32>
    %42 = arith.negf %41 : vector<16x64xf32>
    %43 = math.exp %42 : vector<16x64xf32>
    %cst_43 = arith.constant 1.000000e+00 : f32
    %44 = vector.broadcast %cst_43 : f32 to vector<16x64xf32>
    %45 = arith.addf %44, %43 : vector<16x64xf32>
    %46 = arith.divf %44, %45 : vector<16x64xf32>
    %47 = vector.extract_strided_slice %37 {offsets = [0, 64], sizes = [16, 64], strides = [1, 1]} : vector<16x256xf32> to vector<16x64xf32>
    %48 = vector.broadcast %19 : vector<1x64xf32> to vector<16x64xf32>
    %49 = arith.mulf %48, %7 : vector<16x64xf32>
    %50 = arith.addf %47, %49 : vector<16x64xf32>
    %51 = arith.negf %50 : vector<16x64xf32>
    %52 = math.exp %51 : vector<16x64xf32>
    %cst_44 = arith.constant 1.000000e+00 : f32
    %53 = vector.broadcast %cst_44 : f32 to vector<16x64xf32>
    %54 = arith.addf %53, %52 : vector<16x64xf32>
    %55 = arith.divf %53, %54 : vector<16x64xf32>
    %56 = vector.extract_strided_slice %37 {offsets = [0, 128], sizes = [16, 64], strides = [1, 1]} : vector<16x256xf32> to vector<16x64xf32>
    %57 = math.tanh %56 : vector<16x64xf32>
    %58 = arith.mulf %55, %7 : vector<16x64xf32>
    %59 = arith.mulf %46, %57 : vector<16x64xf32>
    %60 = arith.addf %58, %59 : vector<16x64xf32>
    %61 = vector.extract_strided_slice %37 {offsets = [0, 192], sizes = [16, 64], strides = [1, 1]} : vector<16x256xf32> to vector<16x64xf32>
    %62 = vector.broadcast %21 : vector<1x64xf32> to vector<16x64xf32>
    %63 = arith.mulf %62, %60 : vector<16x64xf32>
    %64 = arith.addf %61, %63 : vector<16x64xf32>
    %65 = arith.negf %64 : vector<16x64xf32>
    %66 = math.exp %65 : vector<16x64xf32>
    %cst_45 = arith.constant 1.000000e+00 : f32
    %67 = vector.broadcast %cst_45 : f32 to vector<16x64xf32>
    %68 = arith.addf %67, %66 : vector<16x64xf32>
    %69 = arith.divf %67, %68 : vector<16x64xf32>
    %70 = math.tanh %60 : vector<16x64xf32>
    %71 = arith.mulf %69, %70 : vector<16x64xf32>
    %72 = vector.broadcast %9 : vector<16x1xf32> to vector<16x64xf32>
    %73 = arith.mulf %71, %72 : vector<16x64xf32>
    %cst_46 = arith.constant dense<0.000000e+00> : vector<64xf32>
    %74 = vector.multi_reduction <add>, %73, %cst_46 [0] : vector<16x64xf32> to vector<64xf32>
    %75 = vector.shape_cast %74 : vector<64xf32> to vector<1x64xf32>
    %76 = arith.mulf %75, %27 : vector<1x64xf32>
    %77 = vector.broadcast %76 : vector<1x64xf32> to vector<16x64xf32>
    %78 = arith.subf %71, %77 : vector<16x64xf32>
    %79 = arith.mulf %78, %78 : vector<16x64xf32>
    %80 = vector.broadcast %9 : vector<16x1xf32> to vector<16x64xf32>
    %81 = arith.mulf %79, %80 : vector<16x64xf32>
    %cst_47 = arith.constant dense<0.000000e+00> : vector<64xf32>
    %82 = vector.multi_reduction <add>, %81, %cst_47 [0] : vector<16x64xf32> to vector<64xf32>
    %83 = vector.shape_cast %82 : vector<64xf32> to vector<1x64xf32>
    %84 = vector.broadcast %23 : vector<1x64xf32> to vector<16x64xf32>
    %85 = arith.mulf %84, %78 : vector<16x64xf32>
    %cst_48 = arith.constant 9.99999974E-6 : f32
    %86 = vector.broadcast %cst_48 : f32 to vector<1x64xf32>
    %87 = arith.addf %83, %86 : vector<1x64xf32>
    %88 = math.rsqrt %87 : vector<1x64xf32>
    %89 = vector.broadcast %88 : vector<1x64xf32> to vector<16x64xf32>
    %90 = arith.mulf %85, %89 : vector<16x64xf32>
    %91 = vector.broadcast %25 : vector<1x64xf32> to vector<16x64xf32>
    %92 = arith.addf %90, %91 : vector<16x64xf32>
    %93 = tpu.concatenate %92, %60 in 1 : vector<16x64xf32>, vector<16x64xf32> -> vector<16x128xf32>
    %c0_49 = arith.constant 0 : index
    %c0_50 = arith.constant 0 : index
    %c0_51 = arith.constant 0 : index
    %94 = vector.load %arg19[%c0_49, %c0_50, %c0_51] : memref<1x16x128xf32, #tpu.memory_space<vmem>>, vector<1x16x128xf32>
    %95 = vector.shape_cast %94 : vector<1x16x128xf32> to vector<16x128xf32>
    %96 = vector.shape_cast %93 : vector<16x128xf32> to vector<1x16x128xf32>
    tpu.vector_store %arg19[%c0_49, %c0_50, %c0_51], %96 {strides = array<i32>} : memref<1x16x128xf32, #tpu.memory_space<vmem>>, vector<1x16x128xf32>,
    %c0_52 = arith.constant 0 : index
    %c0_53 = arith.constant 0 : index
    %97 = vector.load %arg15[%c0_52, %c0_53] : memref<64x32xf32, #tpu.memory_space<vmem>>, vector<64x32xf32>
    %cst_54 = arith.constant dense<0.000000e+00> : vector<16x32xf32>
    %98 = tpu.matmul %92, %97, %cst_54 {dimension_numbers = #tpu.dot_dimension_numbers<[1], [0], [0], [1], [0, 0, 1, 1], [], []>} : vector<16x64xf32>, vector<64x32xf32>, vector<16x32xf32> -> vector<16x32xf32>
    %c0_55 = arith.constant 0 : index
    %c0_56 = arith.constant 0 : index
    %99 = vector.load %arg16[%c0_55, %c0_56] : memref<1x32xf32, #tpu.memory_space<vmem>>, vector<1x32xf32>
    %100 = vector.broadcast %99 : vector<1x32xf32> to vector<16x32xf32>
    %101 = arith.addf %98, %100 : vector<16x32xf32>
    %cst_57 = arith.constant 0.000000e+00 : f32
    %102 = vector.broadcast %cst_57 : f32 to vector<16x32xf32>
    %103 = arith.maximumf %101, %102 : vector<16x32xf32>
    %c0_58 = arith.constant 0 : index
    %c0_59 = arith.constant 0 : index
    %104 = vector.load %arg17[%c0_58, %c0_59] : memref<32x128xf32, #tpu.memory_space<vmem>>, vector<32x128xf32>
    %cst_60 = arith.constant dense<0.000000e+00> : vector<16x128xf32>
    %105 = tpu.matmul %103, %104, %cst_60 {dimension_numbers = #tpu.dot_dimension_numbers<[1], [0], [0], [1], [0, 0, 1, 1], [], []>} : vector<16x32xf32>, vector<32x128xf32>, vector<16x128xf32> -> vector<16x128xf32>
    %c0_61 = arith.constant 0 : index
    %c0_62 = arith.constant 0 : index
    %106 = vector.load %arg18[%c0_61, %c0_62] : memref<1x128xf32, #tpu.memory_space<vmem>>, vector<1x128xf32>
    %107 = vector.broadcast %106 : vector<1x128xf32> to vector<16x128xf32>
    %108 = arith.addf %105, %107 : vector<16x128xf32>
    %c0_63 = arith.constant 0 : index
    %c0_64 = arith.constant 0 : index
    %c0_65 = arith.constant 0 : index
    %109 = vector.load %arg20[%c0_63, %c0_64, %c0_65] : memref<1x16x128xf32, #tpu.memory_space<vmem>>, vector<1x16x128xf32>
    %110 = vector.shape_cast %109 : vector<1x16x128xf32> to vector<16x128xf32>
    %111 = vector.shape_cast %108 : vector<16x128xf32> to vector<1x16x128xf32>
    tpu.vector_store %arg20[%c0_63, %c0_64, %c0_65], %111 {strides = array<i32>} : memref<1x16x128xf32, #tpu.memory_space<vmem>>, vector<1x16x128xf32>,
    return
  }
  func.func @transform_0(%arg0: i32) -> (i32, i32, i32) {
    %c0_i32 = arith.constant 0 : i32
    %c0_i32_0 = arith.constant 0 : i32
    %c0_i32_1 = arith.constant 0 : i32
    return %arg0, %c0_i32, %c0_i32_0 : i32, i32, i32
  }
  func.func @transform_1(%arg0: i32) -> (i32, i32, i32) {
    %c0_i32 = arith.constant 0 : i32
    %c0_i32_0 = arith.constant 0 : i32
    %c0_i32_1 = arith.constant 0 : i32
    return %arg0, %c0_i32, %c0_i32_0 : i32, i32, i32
  }
  func.func @transform_2(%arg0: i32) -> (i32, i32, i32) {
    %c0_i32 = arith.constant 0 : i32
    %c0_i32_0 = arith.constant 0 : i32
    %c0_i32_1 = arith.constant 0 : i32
    return %arg0, %c0_i32, %c0_i32_0 : i32, i32, i32
  }
  func.func @transform_3(%arg0: i32) -> (i32, i32, i32) {
    %c0_i32 = arith.constant 0 : i32
    %c0_i32_0 = arith.constant 0 : i32
    %c0_i32_1 = arith.constant 0 : i32
    return %arg0, %c0_i32, %c0_i32_0 : i32, i32, i32
  }
  func.func @transform_4(%arg0: i32) -> (i32, i32, i32) {
    %c0_i32 = arith.constant 0 : i32
    %c0_i32_0 = arith.constant 0 : i32
    %c0_i32_1 = arith.constant 0 : i32
    return %arg0, %c0_i32, %c0_i32_0 : i32, i32, i32
  }
  func.func @transform_5(%arg0: i32) -> (i32, i32, i32) {
    %c0_i32 = arith.constant 0 : i32
    %c0_i32_0 = arith.constant 0 : i32
    %c0_i32_1 = arith.constant 0 : i32
    return %arg0, %c0_i32, %c0_i32_0 : i32, i32, i32
  }
  func.func @transform_6(%arg0: i32) -> (i32, i32, i32) {
    %c0_i32 = arith.constant 0 : i32
    %c0_i32_0 = arith.constant 0 : i32
    %c0_i32_1 = arith.constant 0 : i32
    return %arg0, %c0_i32, %c0_i32_0 : i32, i32, i32
  }
  func.func @transform_7(%arg0: i32) -> (i32, i32, i32) {
    %c0_i32 = arith.constant 0 : i32
    %c0_i32_0 = arith.constant 0 : i32
    %c0_i32_1 = arith.constant 0 : i32
    return %arg0, %c0_i32, %c0_i32_0 : i32, i32, i32
  }
  func.func @transform_8(%arg0: i32) -> (i32, i32, i32) {
    %c0_i32 = arith.constant 0 : i32
    %c0_i32_0 = arith.constant 0 : i32
    %c0_i32_1 = arith.constant 0 : i32
    return %arg0, %c0_i32, %c0_i32_0 : i32, i32, i32
  }
  func.func @transform_9(%arg0: i32) -> (i32, i32, i32) {
    %c0_i32 = arith.constant 0 : i32
    %c0_i32_0 = arith.constant 0 : i32
    %c0_i32_1 = arith.constant 0 : i32
    return %arg0, %c0_i32, %c0_i32_0 : i32, i32, i32
  }
  func.func @transform_10(%arg0: i32) -> (i32, i32, i32) {
    %c0_i32 = arith.constant 0 : i32
    %c0_i32_0 = arith.constant 0 : i32
    %c0_i32_1 = arith.constant 0 : i32
    return %arg0, %c0_i32, %c0_i32_0 : i32, i32, i32
  }
  func.func @transform_11(%arg0: i32) -> (i32, i32, i32) {
    %c0_i32 = arith.constant 0 : i32
    %c0_i32_0 = arith.constant 0 : i32
    %c0_i32_1 = arith.constant 0 : i32
    return %arg0, %c0_i32, %c0_i32_0 : i32, i32, i32
  }
  func.func @transform_12(%arg0: i32) -> (i32, i32, i32) {
    %c0_i32 = arith.constant 0 : i32
    %c0_i32_0 = arith.constant 0 : i32
    %c0_i32_1 = arith.constant 0 : i32
    return %arg0, %c0_i32, %c0_i32_0 : i32, i32, i32
  }
  func.func @transform_13(%arg0: i32) -> (i32, i32, i32) {
    %c0_i32 = arith.constant 0 : i32
    %c0_i32_0 = arith.constant 0 : i32
    %c0_i32_1 = arith.constant 0 : i32
    return %arg0, %c0_i32, %c0_i32_0 : i32, i32, i32
  }
  func.func @transform_14(%arg0: i32) -> (i32, i32) {
    %c0_i32 = arith.constant 0 : i32
    %c0_i32_0 = arith.constant 0 : i32
    %c0_i32_1 = arith.constant 0 : i32
    return %c0_i32, %c0_i32_0 : i32, i32
  }
  func.func @transform_15(%arg0: i32) -> (i32, i32) {
    %c0_i32 = arith.constant 0 : i32
    %c0_i32_0 = arith.constant 0 : i32
    %c0_i32_1 = arith.constant 0 : i32
    return %c0_i32, %c0_i32_0 : i32, i32
  }
  func.func @transform_16(%arg0: i32) -> (i32, i32) {
    %c0_i32 = arith.constant 0 : i32
    %c0_i32_0 = arith.constant 0 : i32
    %c0_i32_1 = arith.constant 0 : i32
    return %c0_i32, %c0_i32_0 : i32, i32
  }
  func.func @transform_17(%arg0: i32) -> (i32, i32) {
    %c0_i32 = arith.constant 0 : i32
    %c0_i32_0 = arith.constant 0 : i32
    %c0_i32_1 = arith.constant 0 : i32
    return %c0_i32, %c0_i32_0 : i32, i32
  }
  func.func @transform_18(%arg0: i32) -> (i32, i32, i32) {
    %c0_i32 = arith.constant 0 : i32
    %c0_i32_0 = arith.constant 0 : i32
    %c0_i32_1 = arith.constant 0 : i32
    return %arg0, %c0_i32, %c0_i32_0 : i32, i32, i32
  }
  func.func @transform_19(%arg0: i32) -> (i32, i32, i32) {
    %c0_i32 = arith.constant 0 : i32
    %c0_i32_0 = arith.constant 0 : i32
    %c0_i32_1 = arith.constant 0 : i32
    return %arg0, %c0_i32, %c0_i32_0 : i32, i32, i32
  }
}

</mosaic_0001>

<bundles_post_ra>
// kernel: tpu_custom_call.1
= control target key start
LH: loop header
LB: loop body
LE: loop exit
PB: predicated region body
PF: predicated region fallthrough
CT: control target
= control target key end

     0   :  { %s3502_s0 = inlined_call_operand.hbm [shape: f32[2,16,16], index: 0, kind: input, shape index: {}]   ;;  %s3503_s1 = inlined_call_operand.hbm [shape: f32[2,16,64], index: 1, kind: input, shape index: {}]   ;;  %s3504_s2 = inlined_call_operand.hbm [shape: f32[2,16,128], index: 2, kind: input, shape index: {}]   ;;  %s3505_s3 = inlined_call_operand.hbm [shape: f32[2,16,64], index: 3, kind: input, shape index: {}]   ;;  %s3506_s4 = inlined_call_operand.vmem [shape: f32[2,16,1], index: 4, kind: input, shape index: {}]   ;;  %s3507_s5 = inlined_call_operand.vmem [shape: bf16[2,64,256], index: 5, kind: input, shape index: {}]   ;;  %s3508_s6 = inlined_call_operand.hbm [shape: bf16[2,128,256], index: 6, kind: input, shape index: {}]   ;;  %s3509_s7 = inlined_call_operand.hbm [shape: f32[2,1,256], index: 7, kind: input, shape index: {}]   ;;  %s3510_s8 = inlined_call_operand.hbm [shape: f32[2,1,64], index: 8, kind: input, shape index: {}]   ;;  %s3511_s9 = inlined_call_operand.vmem [shape: f32[2,1,64], index: 9, kind: input, shape index: {}]   ;;  %s3512_s10 = inlined_call_operand.vmem [shape: f32[2,1,64], index: 10, kind: input, shape index: {}]   ;;  %s3513_s11 = inlined_call_operand.vmem [shape: f32[2,1,64], index: 11, kind: input, shape index: {}]   ;;  %s3514_s12 = inlined_call_operand.vmem [shape: f32[2,1,64], index: 12, kind: input, shape index: {}]   ;;  %s3515_s13 = inlined_call_operand.vmem [shape: f32[2,1,64], index: 13, kind: input, shape index: {}]   ;;  %s3516_s14 = inlined_call_operand.vmem [shape: f32[64,32], index: 14, kind: input, shape index: {}]   ;;  %s3517_s15 = inlined_call_operand.vmem [shape: f32[1,32], index: 15, kind: input, shape index: {}]   ;;  %s3518_s16 = inlined_call_operand.hbm [shape: f32[32,128], index: 16, kind: input, shape index: {}]   ;;  %s3519_s17 = inlined_call_operand.vmem [shape: f32[1,128], index: 17, kind: input, shape index: {}]   ;;  %s3520_s18 = inlined_call_operand.hbm [shape: f32[2,16,128], index: 18, kind: output, shape index: {0}]   ;;  %s3521_s19 = inlined_call_operand.hbm [shape: f32[2,16,128], index: 19, kind: output, shape index: {1}]  }
   0x1   :  { %3559 = sst [smem:[#allocation33_spill]] %s3502_s0 }
   0x2   :  { %3560 = sst [smem:[#allocation34_spill]] %s3503_s1 }
   0x3   :  { %3561 = sst [smem:[#allocation35_spill]] %s3504_s2 }
   0x4   :  { %3562 = sst [smem:[#allocation36_spill]] %s3505_s3 }
   0x5   :  { %3563 = sst [smem:[#allocation37_spill]] %s3506_s4 }
   0x6   :  { %3564 = sst [smem:[#allocation38_spill]] %s3507_s5 }
   0x7   :  { %3565 = sst [smem:[#allocation39_spill]] %s3509_s7 }
   0x8   :  { %3566 = sst [smem:[#allocation40_spill]] %s3511_s9 }
   0x9   :  { %3567 = sst [smem:[#allocation41_spill]] %s3512_s10 }
   0xa   :  { %3568 = sst [smem:[#allocation42_spill]] %s3513_s11 }
   0xb   :  { %3569 = sst [smem:[#allocation43_spill]] %s3514_s12 }
   0xc   :  { %3570 = sst [smem:[#allocation44_spill]] %s3515_s13 }
   0xd   :  { %3571 = sst [smem:[#allocation45_spill]] %s3516_s14 }
   0xe   :  { %3572 = sst [smem:[#allocation46_spill]] %s3517_s15 }
   0xf   :  { %3573 = sst [smem:[#allocation47_spill]] %s3519_s17 }
  0x10   :  { %3574 = sst [smem:[#allocation48_spill]] %s3520_s18 }
  0x11   :  { %3575 = sst [smem:[#allocation49_spill]] %s3521_s19 }
  0x12   :  { %25 = vsyncpa [#allocation3], 0 }
  0x13   :  { %27 = vsyncpa [#allocation3 + $0x1], 0 }
  0x14   :  { %28 = vsyncpa [#allocation6], 0 }
  0x15   :  { %30 = vsyncpa [#allocation6 + $0x1], 0 }
  0x16   :  { %31 = vsyncpa [#allocation9], 0 }
  0x17   :  { %33 = vsyncpa [#allocation9 + $0x1], 0 }
  0x18   :  { %34 = vsyncpa [#allocation12], 0 }
  0x19   :  { %36 = vsyncpa [#allocation12 + $0x1], 0 }
  0x1a   :  { %37 = vsyncpa [#allocation15], 0 }
  0x1b   :  { %38 = vsyncpa [#allocation4], 0 }
  0x1c   :  { %40 = vsyncpa [#allocation4 + $0x1], 0 }
  0x1d   :  { %41 = vsyncpa [#allocation18], 0 }
  0x1e   :  { %43 = vsyncpa [#allocation18 + $0x1], 0  ;;  %s2863_s0 = smov 0   ;;  %s2865_s30 = smov 0  }
  0x1f   :  { %s2867_s20 = smov 0   ;;  %s2869_s21 = smov 0  }
  0x20 LB: > { %3576 = sst [smem:[#allocation26_spill]] %s2731_s0  ;;  %s2884_s1 = sadd.s32 1, %s2743_s21   ;;  %s2743_s21 = sphi %s2869_s21, %s3630_s21   ;;  %s2739_s20 = sphi %s2867_s20, %s3632_s20   ;;  %s2735_s30 = sphi %s2865_s30, %s3634_s30   ;;  %s2731_s0 = sphi %s2863_s0, %s3633_s0  }
  0x21   : > { %3577 = sst [smem:[#allocation27_spill]] %s2739_s20  ;;  %s56_s22 = sadd.s32 1, %s2739_s20 }
  0x22   : > { %3578 = sst [smem:[#allocation28_spill]] %s2884_s1  ;;  %s53_s2 = ssub.s32 %s2743_s21, %s2884_s1 }
  0x23   : > { %p3530_p0 = scmp.ne.s32.totalorder %s2739_s20, %s2735_s30  ;;  %p54_p1 = scmp.eq.s32.totalorder %s53_s2, 0 }
  0x24   : > { %p64_p2 = scmp.eq.s32.totalorder %s2743_s21, 0  ;;  %p2275_p5 = scmp.lt.s32.totalorder %s2743_s21, 2 }
  0x25   : > { %s2893_s23 = scalar_select %p54_p1, %s2739_s20, %s56_s22  }
  0x26   : > { %p65_p3 = por %p64_p2, %p3530_p0  ;;  %s2901_s24 = sand.u32 1, %s2739_s20  }
  0x27   : > { %3579 = sst [smem:[#allocation29_spill]] %s2893_s23  ;;  %s2904_s25 = sshll.u32 %s2901_s24, 4 }
  0x28   : > { %s2907_s3 = sshll.u32 %s2743_s21, 8  ;;  %p2909_p6 = pnand %p2275_p5, %p65_p3 }
  0x29   : > { %s2914_s27 = sand.u32 1, %s2743_s21   ;;  %s3581_s22 = sld [smem:[#allocation34_spill]] }
  0x2a   : > { %s3580_s26 = scalar_select %p2909_p6, 1, 0 }
  0x2b   : > { %s614_s23 = scalar_lea.vmem [#allocation5], %s2904_s25  ;;  %p2930_p8 = pneg %p2909_p6 }
  0x2c   : > { %s621_s1 = sshll.u32 %s614_s23, 4  ;;  %s2923_s1 = int_to_ptr.vmem [resolvable:$true] %s621_s1 }
  0x2d   : > { %s3582_s18 = scalar_select %p2930_p8, 1, 0 }
  0x2f   : > { %s2920_s2 = scalar_lea.hbm %s3581_s22, %s2907_s3  ;;  %s2396_s15 = scalar_lea.hbm %s3581_s22, 512 }
  0x30   : > { %s2391_s17 = scalar_lea.hbm %s2920_s2, 256  ;;  %p2397_p11 = scmp.lt.u32.totalorder %s2920_s2, %s3581_s22 }
  0x31   : > { %p2392_p7 = scmp.ne.s32.totalorder %s2920_s2, %s2391_s17  ;;  %p2398_p12 = scmp.lt.u32.totalorder %s2396_s15, %s2391_s17 }
  0x32   : > { %p2400_p1 = scmp.lt.u32.totalorder %s2391_s17, %s2920_s2 }
  0x33   : > { %p2394_p9 = pnand %p2930_p8, %p2392_p7  ;;  %p2399_p13 = por %p2398_p12, %p2397_p11 }
  0x35   : > { %p2395_p10 = pneg %p2394_p9  ;;  %p2401_p2 = por %p2400_p1, %p2399_p13 }
  0x37   : > { %p2402_p3 = pnand %p2401_p2, %p2395_p10 }
  0x39   : > { %2405 = shalt.err (!%p2402_p3)
}
  0x3a   : > { %s2406_s19 = scalar_lea.vmem %s2923_s1, 256  ;;  %s2745_s28 = smov [#allocation5]  }
  0x3b   : > { %p2407_p5 = scmp.ne.s32.totalorder %s2923_s1, %s2406_s19  ;;  %s2411_s29 = sshll.u32 %s2745_s28, 4  ;;  %s2412_s29 = int_to_ptr.vmem [resolvable:$false] %s2411_s29 }
  0x3c   : > { %s2413_s12 = scalar_lea.vmem %s2412_s29, 512  ;;  %p2414_p4 = scmp.lt.s32.totalorder %s2923_s1, %s2412_s29 }
  0x3d   : > { %p2409_p7 = pnand %p2407_p5, %p2930_p8  ;;  %p2415_p0 = scmp.lt.s32.totalorder %s2413_s12, %s2406_s19 }
  0x3f   : > { %p2410_p9 = pneg %p2409_p7  ;;  %p2416_p11 = por %p2415_p0, %p2414_p4 }
  0x41   : > { %p2417_p12 = pnand %p2416_p11, %p2410_p9 }
  0x43   : > { %2420 = shalt.err (!%p2417_p12)
}
  0x44   : > { %s3538_s15 = smov 128   ;;  %s3540_s17 = smov 8  }
  0x45   : > { %s3583_s23 = scalar_lea.sflag [#allocation6], %s2914_s27  ;;  %s3584_s29 = sld [smem:[#allocation36_spill]] }
  0x46   : > { %2251 = dma.hbm_to_vmem [thread:$0]  (!%p2909_p6), %s2920_s2, 256, %s2923_s1, %s3583_s23, %s3538_s15, %s3538_s15, %s3540_s17  }
  0x47   : > { %s656_s22 = scalar_lea.vmem [#allocation8], %s2904_s25  ;;  %s3534_s14 = scalar_lea.sflag [#allocation9], %s2914_s27 }
  0x48   : > { %s663_s11 = sshll.u32 %s656_s22, 4  ;;  %s2965_s11 = int_to_ptr.vmem [resolvable:$true] %s663_s11 }
  0x4b   : > { %s2962_s12 = scalar_lea.hbm %s3584_s29, %s2907_s3  ;;  %s2426_s23 = scalar_lea.hbm %s3584_s29, 512 }
  0x4c   : > { %s2421_s13 = scalar_lea.hbm %s2962_s12, 256  ;;  %p2427_p13 = scmp.lt.u32.totalorder %s2962_s12, %s3584_s29 }
  0x4d   : > { %p2422_p0 = scmp.ne.s32.totalorder %s2962_s12, %s2421_s13  ;;  %p2428_p1 = scmp.lt.u32.totalorder %s2426_s23, %s2421_s13 }
  0x4e   : > { %p2430_p3 = scmp.lt.u32.totalorder %s2421_s13, %s2962_s12 }
  0x4f   : > { %p2424_p4 = pnand %p2422_p0, %p2930_p8  ;;  %p2429_p2 = por %p2428_p1, %p2427_p13 }
  0x51   : > { %p2425_p10 = pneg %p2424_p4  ;;  %p2431_p5 = por %p2430_p3, %p2429_p2 }
  0x53   : > { %p2432_p7 = pnand %p2431_p5, %p2425_p10 }
  0x55   : > { %2435 = shalt.err (!%p2432_p7)
}
  0x56   : > { %s2436_s22 = scalar_lea.vmem %s2965_s11, 256  ;;  %s2748_s1 = smov [#allocation8]  }
  0x57   : > { %p2437_p9 = scmp.ne.s32.totalorder %s2965_s11, %s2436_s22  ;;  %s2441_s2 = sshll.u32 %s2748_s1, 4  ;;  %s2442_s2 = int_to_ptr.vmem [resolvable:$false] %s2441_s2 }
  0x58   : > { %s2443_s19 = scalar_lea.vmem %s2442_s2, 512  ;;  %p2444_p0 = scmp.lt.s32.totalorder %s2965_s11, %s2442_s2 }
  0x59   : > { %p2439_p11 = pnand %p2437_p9, %p2930_p8  ;;  %p2445_p4 = scmp.lt.s32.totalorder %s2443_s19, %s2436_s22 }
  0x5b   : > { %p2440_p12 = pneg %p2439_p11  ;;  %p2446_p13 = por %p2445_p4, %p2444_p0 }
  0x5d   : > { %p2447_p1 = pnand %p2446_p13, %p2440_p12 }
  0x5f   : > { %2450 = shalt.err (!%p2447_p1)
}
  0x60   : > { %2257 = dma.hbm_to_vmem [thread:$0]  (!%p2909_p6), %s2962_s12, 256, %s2965_s11, %s3534_s14, %s3538_s15, %s3538_s15, %s3540_s17  }
  0x61   : > { %s2057_s13 = sshll.u32 %s2901_s24, 1  ;;  %s2132_s23 = sshll.u32 %s2743_s21, 5 }
  0x62   : > { %s3585_s7 = sld [smem:[#allocation39_spill]]  ;;  %s714_s2 = scalar_lea.vmem [#allocation11], %s2057_s13 }
  0x63   : > { %s722_s19 = sshll.u32 %s714_s2, 4  ;;  %s3537_s29 = scalar_lea.sflag [#allocation12], %s2914_s27  ;;  %s723_s19 = int_to_ptr.vmem [resolvable:$true] %s722_s19 }
  0x68   : > { %s2999_s1 = scalar_lea.hbm %s3585_s7, %s2132_s23  ;;  %s2456_s14 = scalar_lea.hbm %s3585_s7, 64 }
  0x69   : > { %s2451_s4 = scalar_lea.hbm %s2999_s1, 32  ;;  %p2457_p5 = scmp.lt.u32.totalorder %s2999_s1, %s3585_s7 }
  0x6a   : > { %p2452_p10 = scmp.ne.s32.totalorder %s2999_s1, %s2451_s4  ;;  %p2458_p7 = scmp.lt.u32.totalorder %s2456_s14, %s2451_s4 }
  0x6b   : > { %p2460_p11 = scmp.lt.u32.totalorder %s2451_s4, %s2999_s1 }
  0x6c   : > { %p2454_p2 = pnand %p2452_p10, %p2930_p8  ;;  %p2459_p9 = por %p2458_p7, %p2457_p5 }
  0x6e   : > { %p2455_p3 = pneg %p2454_p2  ;;  %p2461_p12 = por %p2460_p11, %p2459_p9 }
  0x70   : > { %p2462_p0 = pnand %p2461_p12, %p2455_p3 }
  0x72   : > { %2465 = shalt.err (!%p2462_p0)
}
  0x73   : > { %s2466_s13 = scalar_lea.vmem %s723_s19, 32  ;;  %s2749_s22 = smov [#allocation11]  }
  0x74   : > { %p2467_p4 = scmp.ne.s32.totalorder %s723_s19, %s2466_s13  ;;  %s2471_s2 = sshll.u32 %s2749_s22, 4  ;;  %s2472_s2 = int_to_ptr.vmem [resolvable:$false] %s2471_s2 }
  0x75   : > { %s2473_s11 = scalar_lea.vmem %s2472_s2, 64  ;;  %p2474_p10 = scmp.lt.s32.totalorder %s723_s19, %s2472_s2 }
  0x76   : > { %p2469_p13 = pnand %p2467_p4, %p2930_p8  ;;  %p2475_p2 = scmp.lt.s32.totalorder %s2473_s11, %s2466_s13 }
  0x78   : > { %p2470_p1 = pneg %p2469_p13  ;;  %p2476_p6 = por %p2475_p2, %p2474_p10 }
  0x7a   : > { %p2477_p5 = pnand %p2476_p6, %p2470_p1 }
  0x7c   : > { %2480 = shalt.err (!%p2477_p5)
}
  0x7d   : > { %p3586_p7 = scmp.ne.s32.totalorder %s3580_s26, 0  ;;  %s3022_s4 = sadd.s32 4294967295, %s2743_s21  }
  0x7e   : > { %3587 = sst [smem:[#allocation30_spill]] %s3022_s4  ;;  %s2038_s14 = sadd.s32 4294967294, %s2743_s21  }
  0x7f   : > { %2263 = dma.hbm_to_vmem [thread:$0]  (!%p3586_p7), %s2999_s1, 32, %s723_s19, %s3537_s29  }
  0x80   : > { %p69_p6 = scmp.ne.s32.totalorder %s2735_s30, %s2731_s0  ;;  %p3545_p3 = scmp.eq.s32.totalorder %s3022_s4, 0 }
  0x81   : > { %p515_p9 = scmp.eq.s32.totalorder %s3022_s4, 1  ;;  %p521_p11 = scmp.eq.s32.totalorder %s2038_s14, 1 }
  0x82   : > { %p3031_p12 = por %p3545_p3, %p69_p6  ;;  %p2039_p0 = scmp.ge.s32.totalorder %s2743_s21, 1 }
  0x83   : > { %p3589_p4 = scmp.ne.s32.totalorder %s2739_s20, %s2735_s30  ;;  %p3043_p1 = por %p521_p11, %p69_p6 }
  0x84   : > { %s3588_s12 = scalar_select %p3031_p12, 1, 0 }
  0x85   : > { %p3039_p13 = por %p515_p9, %p3589_p4  ;;  %p554_p10 = scmp.lt.s32.totalorder %s2743_s21, 3 }
  0x86   : > { %s3592_s19 = scalar_select %p3043_p1, 1, 0 }
  0x87   : > { %s3590_s1 = scalar_select %p3039_p13, 1, 0 }
  0x88   : > { %3593 = sst [smem:[#allocation32_spill]] %s3592_s19  ;;  %p3048_p2 = pnand %p2039_p0, %p554_p10 }
  0x89   : > { %3591 = sst [smem:[#allocation31_spill]] %s3590_s1  ;;  %s2750_s23 = smov [#allocation14]  }
  0x8a   : > { %s3594_s28 = scalar_select %p3048_p2, 1, 0 }
  0x8b   : > { %s572_s13 = sshll.u32 %s2750_s23, 4  ;;  %p2241_p5 = pneg %p3048_p2  ;;  %s3052_s13 = int_to_ptr.vmem [resolvable:$true] %s572_s13 }
  0x8c   : > { %s3595_s11 = sld [smem:[#allocation33_spill]]  ;;  %s593_s29 = scalar_lea.vmem [#allocation2], %s2904_s25 }
  0x8d   : > { %s600_s15 = sshll.u32 %s593_s29, 4  ;;  %p3065_p6 = pnand %p2241_p5, %p3545_p3  ;;  %s3069_s15 = int_to_ptr.vmem [resolvable:$true] %s600_s15 }
  0x8e   : > { %s590_s23 = scalar_lea.sflag [#allocation3], %s2901_s24 }
  0x8f   : > { %s3596_s17 = scalar_select %p3065_p6, 1, 0 }
  0x92   : > { %s3060_s14 = scalar_lea.hbm %s3595_s11, %s2907_s3  ;;  %s2486_s20 = scalar_lea.hbm %s3595_s11, 512 }
  0x93   : > { %s2481_s7 = scalar_lea.hbm %s3060_s14, 256  ;;  %p2487_p4 = scmp.lt.u32.totalorder %s3060_s14, %s3595_s11 }
  0x94   : > { %p2482_p9 = scmp.ne.s32.totalorder %s3060_s14, %s2481_s7  ;;  %p2488_p10 = scmp.lt.u32.totalorder %s2486_s20, %s2481_s7 }
  0x95   : > { %p2490_p3 = scmp.lt.u32.totalorder %s2481_s7, %s3060_s14 }
  0x96   : > { %p2484_p11 = pnand %p2482_p9, %p2930_p8  ;;  %p2489_p5 = por %p2488_p10, %p2487_p4 }
  0x98   : > { %p2485_p0 = pneg %p2484_p11  ;;  %p2491_p1 = por %p2490_p3, %p2489_p5 }
  0x9a   : > { %p2492_p13 = pnand %p2491_p1, %p2485_p0 }
  0x9c   : > { %2495 = shalt.err (!%p2492_p13)
}
  0x9d   : > { %s2496_s29 = scalar_lea.vmem %s3069_s15, 256  ;;  %s2751_s22 = smov [#allocation2]  }
  0x9e   : > { %p2497_p9 = scmp.ne.s32.totalorder %s3069_s15, %s2496_s29  ;;  %s2501_s2 = sshll.u32 %s2751_s22, 4  ;;  %s2502_s2 = int_to_ptr.vmem [resolvable:$false] %s2501_s2 }
  0x9f   : > { %s2503_s0 = scalar_lea.vmem %s2502_s2, 512  ;;  %p2504_p2 = scmp.lt.s32.totalorder %s3069_s15, %s2502_s2 }
  0xa0   : > { %p2499_p11 = pnand %p2497_p9, %p2930_p8  ;;  %p2505_p6 = scmp.lt.s32.totalorder %s2503_s0, %s2496_s29 }
  0xa2   : > { %p2500_p12 = pneg %p2499_p11  ;;  %p2506_p4 = por %p2505_p6, %p2504_p2 }
  0xa4   : > { %p2507_p10 = pnand %p2506_p4, %p2500_p12 }
  0xa6   : > { %2510 = shalt.err (!%p2507_p10)
}
  0xa7   : > { %s3597_s7 = smov 8   ;;  %s3598_s20 = smov 128  }
  0xa8   : > { %2248 = dma.hbm_to_vmem [thread:$0]  (!%p3586_p7), %s3060_s14, 256, %s3069_s15, %s590_s23, %s3598_s20, %s3598_s20, %s3597_s7  }
  0xa9   : > { %s3599_s11 = sld [smem:[#allocation35_spill]]  ;;  %s2511_s1 = scalar_lea.hbm %s3518_s16, 512 }
  0xaa   : > { %p2512_p3 = scmp.ne.s32.totalorder %s3518_s16, %s2511_s1  ;;  %p3600_p12 = scmp.ne.s32.totalorder %s3596_s17, 0 }
  0xab   : > { %p2518_p6 = scmp.lt.u32.totalorder %s2511_s1, %s3518_s16 }
  0xac   : > { %p2513_p13 = pneg %p3600_p12 }
  0xae   : > { %p2514_p1 = pnand %p2513_p13, %p2512_p3 }
  0xaf   : > { %s3102_s2 = scalar_lea.hbm %s3599_s11, %s2907_s3 }
  0xb0   : > { %p2515_p2 = pneg %p2514_p1 }
  0xb2   : > { %p2520_p0 = pnand %p2518_p6, %p2515_p2 }
  0xb4   : > { %2523 = shalt.err (!%p2520_p0)
}
  0xb5   : > { %s2524_s3 = scalar_lea.vmem %s3052_s13, 512  ;;  %p2532_p4 = scmp.lt.s32.totalorder %s3052_s13, %s3052_s13 }
  0xb6   : > { %p2525_p5 = scmp.ne.s32.totalorder %s3052_s13, %s2524_s3  ;;  %p2533_p10 = scmp.lt.s32.totalorder %s2524_s3, %s2524_s3 }
  0xb8   : > { %p2527_p9 = pnand %p2525_p5, %p2513_p13  ;;  %p2534_p7 = por %p2533_p10, %p2532_p4 }
  0xba   : > { %p2528_p11 = pneg %p2527_p9 }
  0xbc   : > { %p2535_p8 = pnand %p2534_p7, %p2528_p11 }
  0xbe   : > { %2538 = shalt.err (!%p2535_p8)
}
  0xbf   : > { %2244 = dma.hbm_to_vmem [thread:$0]  (!%p3600_p12), %s3518_s16, 512, %s3052_s13, [#allocation15], %s3598_s20, %s3598_s20, %s3597_s7  }
  0xc0   : > { %s635_s10 = scalar_lea.vmem [#allocation7], %s2904_s25  ;;  %s2054_s4 = sshll.u32 %s2901_s24, 7 }
  0xc1   : > { %s642_s15 = sshll.u32 %s635_s10, 4  ;;  %s2539_s17 = scalar_lea.hbm %s3102_s2, 256  ;;  %s3130_s15 = int_to_ptr.vmem [resolvable:$true] %s642_s15 }
  0xc2   : > { %p2540_p8 = scmp.ne.s32.totalorder %s3102_s2, %s2539_s17  ;;  %p3601_p7 = scmp.ne.s32.totalorder %s3582_s18, 0 }
  0xc3   : > { %s2544_s23 = scalar_lea.hbm %s3599_s11, 512  ;;  %p2545_p1 = scmp.lt.u32.totalorder %s3102_s2, %s3599_s11 }
  0xc4   : > { %p2542_p3 = pnand %p2540_p8, %p3601_p7  ;;  %p2546_p2 = scmp.lt.u32.totalorder %s2544_s23, %s2539_s17 }
  0xc5   : > { %p2548_p6 = scmp.lt.u32.totalorder %s2539_s17, %s3102_s2 }
  0xc6   : > { %p2543_p13 = pneg %p2542_p3  ;;  %p2547_p12 = por %p2546_p2, %p2545_p1 }
  0xc8   : > { %p2549_p0 = por %p2548_p6, %p2547_p12 }
  0xca   : > { %p2550_p5 = pnand %p2549_p0, %p2543_p13 }
  0xcc   : > { %2553 = shalt.err (!%p2550_p5)
}
  0xcd   : > { %s2554_s25 = scalar_lea.vmem %s3130_s15, 256  ;;  %s2752_s13 = smov [#allocation7]  }
  0xce   : > { %p2555_p9 = scmp.ne.s32.totalorder %s3130_s15, %s2554_s25  ;;  %s2559_s29 = sshll.u32 %s2752_s13, 4  ;;  %s2560_s29 = int_to_ptr.vmem [resolvable:$false] %s2559_s29 }
  0xcf   : > { %s2561_s0 = scalar_lea.vmem %s2560_s29, 512  ;;  %p2562_p10 = scmp.lt.s32.totalorder %s3130_s15, %s2560_s29 }
  0xd0   : > { %p2557_p11 = pnand %p2555_p9, %p3601_p7  ;;  %p2563_p8 = scmp.lt.s32.totalorder %s2561_s0, %s2554_s25 }
  0xd2   : > { %p2558_p4 = pneg %p2557_p11  ;;  %p2564_p3 = por %p2563_p8, %p2562_p10 }
  0xd4   : > { %p2565_p1 = pnand %p2564_p3, %p2558_p4 }
  0xd6   : > { %2568 = shalt.err (!%p2565_p1)
}
  0xd7   : > { %p3602_p13 = scmp.ne.s32.totalorder %s3580_s26, 0  ;;  %s3603_s3 = scalar_lea.sflag [#allocation6], %s2914_s27 }
  0xd8   : > { %s2131_s5 = sshll.u32 %s2743_s21, 11  ;;  %s693_s9 = scalar_lea.vmem [#allocation10], %s2054_s4 }
  0xd9   : > { %2254 = dma.hbm_to_vmem [thread:$0]  (!%p3602_p13), %s3102_s2, 256, %s3130_s15, %s3603_s3, %s3598_s20, %s3598_s20, %s3597_s7  }
  0xda   : > { %s700_s10 = sshll.u32 %s693_s9, 4  ;;  %s3164_s14 = scalar_lea.hbm %s3508_s6, %s2131_s5  ;;  %s3166_s10 = int_to_ptr.vmem [resolvable:$true] %s700_s10 }
  0xdb   : > { %s2569_s23 = scalar_lea.hbm %s3164_s14, 2048  ;;  %s2574_s4 = scalar_lea.hbm %s3508_s6, 4096 }
  0xdc   : > { %p2570_p2 = scmp.ne.s32.totalorder %s3164_s14, %s2569_s23  ;;  %p2575_p0 = scmp.lt.u32.totalorder %s3164_s14, %s3508_s6 }
  0xdd   : > { %p2576_p5 = scmp.lt.u32.totalorder %s2574_s4, %s2569_s23  ;;  %p2578_p11 = scmp.lt.u32.totalorder %s2569_s23, %s3164_s14 }
  0xde   : > { %p2572_p12 = pnand %p2570_p2, %p3601_p7 }
  0xdf   : > { %p2577_p9 = por %p2576_p5, %p2575_p0 }
  0xe0   : > { %p2573_p6 = pneg %p2572_p12 }
  0xe1   : > { %p2579_p4 = por %p2578_p11, %p2577_p9 }
  0xe3   : > { %p2580_p10 = pnand %p2579_p4, %p2573_p6 }
  0xe5   : > { %2583 = shalt.err (!%p2580_p10)
}
  0xe6   : > { %s2584_s25 = scalar_lea.vmem %s3166_s10, 2048  ;;  %s2753_s13 = smov [#allocation10]  }
  0xe7   : > { %p2585_p8 = scmp.ne.s32.totalorder %s3166_s10, %s2584_s25  ;;  %s2589_s29 = sshll.u32 %s2753_s13, 4  ;;  %s2590_s29 = int_to_ptr.vmem [resolvable:$false] %s2589_s29 }
  0xe8   : > { %s2591_s0 = scalar_lea.vmem %s2590_s29, 4096  ;;  %p2592_p2 = scmp.lt.s32.totalorder %s3166_s10, %s2590_s29 }
  0xe9   : > { %p2587_p3 = pnand %p2585_p8, %p3601_p7  ;;  %p2593_p12 = scmp.lt.s32.totalorder %s2591_s0, %s2584_s25 }
  0xeb   : > { %p2588_p1 = pneg %p2587_p3  ;;  %p2594_p0 = por %p2593_p12, %p2592_p2 }
  0xed   : > { %p2595_p5 = pnand %p2594_p0, %p2588_p1 }
  0xef   : > { %2598 = shalt.err (!%p2595_p5)
}
  0xf0   : > { %s3604_s3 = scalar_lea.sflag [#allocation9], %s2914_s27  ;;  %s2060_s5 = sshll.u32 %s2743_s21, 4 }
  0xf1   : > { %2260 = dma.hbm_to_vmem [thread:$0]  (!%p3602_p13), %s3164_s14, 2048, %s3166_s10, %s3604_s3, %s3598_s20, %s3598_s20, %s3597_s7  }
  0xf2   : > { %s3198_s1 = scalar_lea.hbm %s3510_s8, %s2060_s5  ;;  %s732_s23 = scalar_lea.vmem [#allocation13], %s2901_s24 }
  0xf3   : > { %s739_s2 = sshll.u32 %s732_s23, 4  ;;  %s2599_s15 = scalar_lea.hbm %s3198_s1, 16  ;;  %s740_s2 = int_to_ptr.vmem [resolvable:$true] %s739_s2 }
  0xf4   : > { %p2600_p6 = scmp.ne.s32.totalorder %s3198_s1, %s2599_s15  ;;  %s2604_s20 = scalar_lea.hbm %s3510_s8, 32 }
  0xf5   : > { %p2605_p4 = scmp.lt.u32.totalorder %s3198_s1, %s3510_s8  ;;  %p2606_p10 = scmp.lt.u32.totalorder %s2604_s20, %s2599_s15 }
  0xf6   : > { %p2602_p9 = pnand %p2600_p6, %p3601_p7  ;;  %p2608_p3 = scmp.lt.u32.totalorder %s2599_s15, %s3198_s1 }
  0xf7   : > { %p2607_p8 = por %p2606_p10, %p2605_p4 }
  0xf8   : > { %p2603_p11 = pneg %p2602_p9 }
  0xf9   : > { %p2609_p1 = por %p2608_p3, %p2607_p8 }
  0xfb   : > { %p2610_p2 = pnand %p2609_p1, %p2603_p11 }
  0xfd   : > { %2613 = shalt.err (!%p2610_p2)
}
  0xfe   : > { %s2614_s24 = scalar_lea.vmem %s740_s2, 16  ;;  %s2754_s19 = smov [#allocation13]  }
  0xff   : > { %p2615_p12 = scmp.ne.s32.totalorder %s740_s2, %s2614_s24  ;;  %s2619_s22 = sshll.u32 %s2754_s19, 4  ;;  %s2620_s22 = int_to_ptr.vmem [resolvable:$false] %s2619_s22 }
 0x100   : > { %s2621_s25 = scalar_lea.vmem %s2620_s22, 32  ;;  %p2622_p6 = scmp.lt.s32.totalorder %s740_s2, %s2620_s22 }
 0x101   : > { %p2617_p0 = pnand %p2615_p12, %p3601_p7  ;;  %p2623_p9 = scmp.lt.s32.totalorder %s2621_s25, %s2614_s24 }
 0x103   : > { %p2618_p5 = pneg %p2617_p0  ;;  %p2624_p13 = por %p2623_p9, %p2622_p6 }
 0x105   : > { %p2625_p4 = pnand %p2624_p13, %p2618_p5 }
 0x107   : > { %2628 = shalt.err (!%p2625_p4)
}
 0x108   : > { %p3605_p10 = scmp.ne.s32.totalorder %s3580_s26, 0  ;;  %s3606_s13 = scalar_lea.sflag [#allocation12], %s2914_s27 }
 0x109   : > { %p3607_p11 = scmp.ne.s32.totalorder %s3594_s28, 0 }
 0x10a   : > { %2266 = dma.hbm_to_vmem [thread:$0]  (!%p3605_p10), %s3198_s1, 16, %s740_s2, %s3606_s13  }
 0x10b   : > { %778 = sbr.rel (%p3607_p11) target bundleno = 1765 (0x6e5), region = 92  ;;  %s3223_s18 = sand.u32 (!%p3607_p11), 1, %s2735_s30  }
 0x10c   : > { %s3226_s29 = sshll.u32 (!%p3607_p11), %s3223_s18, 4  ;;  %s781_s0 = scalar_lea.sflag (!%p3607_p11), [#allocation3], %s3223_s18 }
 0x10d   : > { %s784_s3 = scalar_lea.vmem (!%p3607_p11), [#allocation2], %s3226_s29  ;;  %p3608_p7 = scmp.ne.s32.totalorder (!%p3607_p11), %s3588_s12, 0 }
 0x112   : > { %2702 = dma.done.wait (%p3608_p7), %s781_s0, 256  }
 0x113   : > { %2704 = vsyncadd (%p3608_p7), %s781_s0, 4294967040  ;;  %s3609_s26 = sld [smem:[#allocation30_spill]]  ;;  %s793_s5 = scalar_lea.vmem [#allocation5], %s3226_s29 }
 0x119   : > { %s789_s27 = sand.u32 1, %s3609_s26  }
 0x11a   : > { %s790_s28 = scalar_lea.sflag [#allocation6], %s789_s27 }
 0x11b   : > { %2706 = dma.done.wait (%p3608_p7), %s790_s28, 512  }
 0x11c   : > { %2708 = vsyncadd (%p3608_p7), %s790_s28, 4294966784  ;;  %s802_s9 = scalar_lea.vmem [#allocation7], %s3226_s29  ;;  %s808_s17 = scalar_lea.sflag [#allocation9], %s789_s27 }
 0x11d   : > { %s811_s1 = scalar_lea.vmem [#allocation8], %s3226_s29 }
 0x11e   : > { %2710 = dma.done.wait (%p3608_p7), %s808_s17, 2304  }
 0x11f   : > { %2712 = vsyncadd (%p3608_p7), %s808_s17, 4294964992  ;;  %s2066_s23 = sshll.u32 %s3223_s18, 7  ;;  %s2067_s2 = sshll.u32 %s3223_s18, 1 }
 0x120   : > { %s3248_s15 = scalar_lea.vmem [#allocation10], %s2066_s23  ;;  %s826_s4 = scalar_lea.sflag [#allocation12], %s789_s27 }
 0x121   : > { %s3250_s7 = scalar_lea.vmem [#allocation11], %s2067_s2 }
 0x122   : > { %2714 = dma.done.wait (%p3608_p7), %s826_s4, 48  }
 0x123   : > { %2716 = vsyncadd (%p3608_p7), %s826_s4, 4294967248  ;;  %s837_s20 = scalar_lea.vmem [#allocation13], %s3223_s18  ;;  %p3610_p13 = scmp.eq.s32.totalorder %s3609_s26, 0 }
 0x125   : > { %2718 = dma.done.wait (%p3610_p13), [#allocation15], 512   ;;  %p3611_p8 = pmov %p3610_p13 }
 0x126   : > { %v2755_v0 = vmov 0.0   ;;  %vm2756_vm0 = vmmov 0   ;;  %p955_p3 = scmp.lt.s32.totalorder %s3609_s26, 1  ;;  %v983_v1 = vld [vmem:[%s793_s5] sm:$0xff]  ;;  %v984_v2 = vld [vmem:[%s793_s5 + $0x8] sm:$0xff]  ;;  %vm1024_vm1 = vcmask 130048   ;;  %v1282_v49 = vlaneseq }
 0x127   : > { %2720 = vsyncadd (%p3611_p8), [#allocation15], 4294966784  ;;  %2155 = vmatprep.subr.bf16.mxu1 %v2755_v0  ;;  %2157 = vmatprep.mubr.msk.bf16.mxu1 %vm2756_vm0, %v2755_v0  ;;  %v981_v3 = vld [vmem:[%s784_s3] sm:$0xff]  ;;  %v1023_v4 = vpack.c.bf16 %v984_v2, %v983_v1  ;;  %v982_v5 = vld [vmem:[%s784_s3 + $0x8] sm:$0xff]  ;;  %s3612_s19 = sld [smem:[#allocation38_spill]]  ;;  %v2757_v34 = vmov 0  }
 0x128   : > { %s3263_s12 = scalar_select %p955_p3, %s3609_s26, 1  ;;  %v1022_v6 = vpack.c.bf16 %v982_v5, %v981_v3  ;;  %v2323_v7 = vld [vmem:[%s3248_s15 + $0x4] ss:$8 sps:$4 sm:$0xff]   ;;  %v2321_v8 = vld [vmem:[%s3248_s15] ss:$8 sps:$4 sm:$0xff]   ;;  %1270 = vmatprep.mubr.bf16.mxu0 %v2757_v34  ;;  %2319 = vset.pattern.permute.xlu0 %v2757_v34  ;;  %vm1234_vm2 = vcmask 523264  }
 0x129   : > { %2156 = vmatpush3.bf16.msra.mxu1 %v1023_v4  ;;  %v2326_v9 = vld [vmem:[%s3248_s15 + $0x14] ss:$8 sps:$4 sm:$0xff]   ;;  %v2324_v10 = vld [vmem:[%s3248_s15 + $0x10] ss:$8 sps:$4 sm:$0xff]   ;;  %v2329_v11 = vld [vmem:[%s3248_s15 + $0x24] ss:$8 sps:$4 sm:$0xff]   ;;  %2320 = vset.pattern.permute.xlu1 %v2757_v34 }
 0x12a   : > { %s2134_s10 = sshll.u32 %s3263_s12, 6  ;;  %1151 = vmatprep.subr.bf16.mxu1 %v2323_v7  ;;  %v2327_v13 = vld [vmem:[%s3248_s15 + $0x20] ss:$8 sps:$4 sm:$0xff]   ;;  %v2332_v16 = vld [vmem:[%s3248_s15 + $0x34] ss:$8 sps:$4 sm:$0xff]   ;;  %s3613_s0 = sld [smem:[#allocation40_spill]] }
 0x12b   : > { %v2330_v19 = vld [vmem:[%s3248_s15 + $0x30] ss:$8 sps:$4 sm:$0xff]   ;;  %v2335_v20 = vld [vmem:[%s3248_s15 + $0x44] ss:$8 sps:$4 sm:$0xff]   ;;  %v2333_v22 = vld [vmem:[%s3248_s15 + $0x40] ss:$8 sps:$4 sm:$0xff]  }
 0x12c   : > { %2158 = vmatmul.mubr.msk.bf16.vlgmr.msra.gmra.mrb[0].mxu1 %vm1024_vm1, %v1022_v6  ;;  %v2340_v23 = vld [vmem:[%s3248_s15 + $0x54] ss:$8 sps:$4 sm:$0xff]   ;;  %v2338_v24 = vld [vmem:[%s3248_s15 + $0x50] ss:$8 sps:$4 sm:$0xff]   ;;  %v2346_v25 = vld [vmem:[%s3248_s15 + $0x64] ss:$8 sps:$4 sm:$0xff]  }
 0x12d   : > { %s3276_s22 = scalar_lea.vmem %s3612_s19, %s2134_s10  ;;  %1152 = vmatpush1.bf16.msra.mxu1 %v2321_v8  ;;  %v2344_v26 = vld [vmem:[%s3248_s15 + $0x60] ss:$8 sps:$4 sm:$0xff]   ;;  %v2352_v27 = vld [vmem:[%s3248_s15 + $0x74] ss:$8 sps:$4 sm:$0xff]   ;;  %v2350_v28 = vld [vmem:[%s3248_s15 + $0x70] ss:$8 sps:$4 sm:$0xff]   ;;  %1183 = vmatprep.mubr.bf16.mxu1 %v2757_v34 }
 0x12e   : > { %1153 = vmatprep.subr.bf16.mxu1 %v2326_v9  ;;  %v2336_v12 = vld [vmem:[%s3276_s22 + $0x4] ss:$8 sps:$4 sm:$0xff]   ;;  %v2341_v14 = vld [vmem:[%s3276_s22] ss:$8 sps:$4 sm:$0xff]   ;;  %v2342_v15 = vld [vmem:[%s3276_s22 + $0x14] ss:$8 sps:$4 sm:$0xff]  }
 0x12f   : > { %1238 = vmatprep.subr.bf16.mxu0 %v2336_v12  ;;  %v2347_v17 = vld [vmem:[%s3276_s22 + $0x10] ss:$8 sps:$4 sm:$0xff]   ;;  %v2348_v18 = vld [vmem:[%s3276_s22 + $0x24] ss:$8 sps:$4 sm:$0xff]   ;;  %v2353_v21 = vld [vmem:[%s3276_s22 + $0x20] ss:$8 sps:$4 sm:$0xff]  }
 0x130   : > { %1239 = vmatpush1.bf16.msra.mxu0 %v2341_v14  ;;  %v2354_v29 = vld [vmem:[%s3276_s22 + $0x34] ss:$8 sps:$4 sm:$0xff]   ;;  %v2356_v33 = vld [vmem:[%s3276_s22 + $0x30] ss:$8 sps:$4 sm:$0xff]   ;;  %s967_s3 = scalar_lea.vmem %s3613_s0, %s3263_s12  ;;  %s2758_s27 = smov 64   ;;  %v3316_v50 = vshrl.u32 %v1282_v49, 7 }
 0x131   : > { %1154 = vmatpush1.bf16.msra.mxu1 %v2324_v10  ;;  %1240 = vmatprep.subr.bf16.mxu0 %v2342_v15  ;;  %v985_v30 = vld [vmem:[%s802_s9] sm:$0xff]  ;;  %v986_v31 = vld [vmem:[%s802_s9 + $0x8] sm:$0xff]  ;;  %s3614_s9 = sld [smem:[#allocation41_spill]]  ;;  %s3615_s15 = sld [smem:[#allocation37_spill]]  ;;  %vm1426_vm3 = vcmask 1048064   ;;  %vm1609_vm4 = vcmask 261120  }
 0x132   : > { %1155 = vmatprep.subr.bf16.mxu1 %v2329_v11  ;;  %v1070_v32 = vpack.c.bf16 %v986_v31, %v985_v30  ;;  %v987_v35 = vld [vmem:[%s811_s1] sm:$0xff]  ;;  %v988_v36 = vld [vmem:[%s811_s1 + $0x8] sm:$0xff]  ;;  %v1284_v51 = vsub.s32 0, %v3316_v50  ;;  %v1288_v6 = vsub.s32 1, %v3316_v50  ;;  %s2133_s1 = sshll.u32 %s3263_s12, 4  ;;  %s3616_s10 = sld [smem:[#allocation44_spill]] }
 0x133   : > { %v2104_v37 = vld [vmem:[%s967_s3] ss:$0 sm:$0xff]  ;;  %1352 = vrot.lane.b32.xlu1 %v987_v35, %s2758_s27  ;;  %s3617_s22 = sld [smem:[#allocation45_spill]]  ;;  %s3619_s13 = sld [smem:[#allocation43_spill]] }
 0x134   : > { %1241 = vmatpush1.bf16.msra.mxu0 %v2347_v17  ;;  %v1324_v38 = vmul.f32 %v2104_v37, %v987_v35  ;;  %v1325_v39 = vmul.f32 %v2104_v37, %v988_v36  ;;  %v1015_v52 = vld [vmem:[%s3250_s7] sm:$0x3]  ;;  %s3620_s28 = sld [smem:[#allocation46_spill]]  ;;  %s3621_s5 = sld [smem:[#allocation31_spill]] }
 0x135   : > { %1156 = vmatpush1.bf16.msra.mxu1 %v2327_v13  ;;  %1242 = vmatprep.subr.bf16.mxu0 %v2348_v18  ;;  %v2101_v53 = vld [vmem:[%s837_s20] ss:$0 sm:$0xff]  ;;  %v1285_v54 = vrot.slane %v1015_v52, %v1284_v51  ;;  %v1289_v8 = vrot.slane %v1015_v52, %v1288_v6  ;;  %s3622_s2 = sld [smem:[#allocation48_spill]]  ;;  %s2759_s20 = smov [#allocation16]  }
 0x136   : > { %1157 = vmatprep.subr.bf16.mxu1 %v2332_v16  ;;  %1328 = vrot.lane.b32.xlu0 %v1324_v38, %s2758_s27  ;;  %v1302_v56 = vmul.f32 %v2101_v53, %v987_v35  ;;  %v1303_v0 = vmul.f32 %v2101_v53, %v988_v36 }
 0x137   : > { %1354 = vrot.lane.b32.xlu1 %v988_v36, %s2758_s27  ;;  %s970_s17 = scalar_lea.vmem %s3614_s9, %s3263_s12  ;;  %s959_s4 = scalar_lea.vmem %s3615_s15, %s2133_s1 }
 0x138   : > { %1243 = vmatpush1.bf16.msra.mxu0 %v2353_v21  ;;  %s979_s14 = scalar_lea.vmem %s3616_s10, %s3263_s12  ;;  %s2633_s10 = sshll.u32 %s2759_s20, 4  ;;  %s2634_s10 = int_to_ptr.vmem [resolvable:$false] %s2633_s10 }
 0x139   : > { %1158 = vmatpush1.bf16.msra.mxu1 %v2330_v19  ;;  %1244 = vmatprep.subr.bf16.mxu0 %v2354_v29  ;;  %s976_s0 = scalar_lea.vmem %s3619_s13, %s3263_s12 }
 0x13a   : > { %1159 = vmatprep.subr.bf16.mxu1 %v2335_v20  ;;  %1330 = vrot.lane.b32.xlu0 %v1325_v39, %s2758_s27  ;;  %p3623_p2 = scmp.ne.s32.totalorder %s3621_s5, 0 }
 0x13c   : > { %1245 = vmatpush1.bf16.msra.mxu0 %v2356_v33 }
 0x13d   : > { %1160 = vmatpush1.bf16.msra.mxu1 %v2333_v22 }
 0x13e   : > { %1161 = vmatprep.subr.bf16.mxu1 %v2340_v23 }
 0x141   : > { %1162 = vmatpush1.bf16.msra.mxu1 %v2338_v24 }
 0x142   : > { %1163 = vmatprep.subr.bf16.mxu1 %v2346_v25 }
 0x145   : > { %1164 = vmatpush1.bf16.msra.mxu1 %v2344_v26 }
 0x146   : > { %1165 = vmatprep.subr.bf16.mxu1 %v2352_v27 }
 0x149   : > { %1166 = vmatpush1.bf16.msra.mxu1 %v2350_v28 }
 0x14c   : > { %1184 = vmatmul.mubr.bf16.vlgmr.msra.gmra.mrb[4].mxu1 %v1070_v32 }
 0x1a5   : > { %v1353_v31 = vpop.permute.xlu1 %1352 }
 0x1a8   : > { %v1329_v21 = vpop.permute.xlu0 %1328 }
 0x1a9   : > { %v1355_v34 = vpop.permute.xlu1 %1354 }
 0x1ac   : > { %v1331_v22 = vpop.permute.xlu0 %1330 }
 0x1ff   : > { %v1062_v40 = vpop.f32.mrb[0].mxu1 }
 0x200   : > { %v2159_v41 = vpop.f32.mrb[1].mxu1 }
 0x201   : > { %v1065_v42 = vpop.f32.mrb[2].mxu1  ;;  %v2107_v41 = vld [vmem:[%s970_s17] ss:$0 sm:$0xff]  ;;  %s2135_s17 = sshll.u32 %s3609_s26, 8 }
 0x202   : > { %v1069_v43 = vpack.c.bf16 %v1065_v42, %v1062_v40  ;;  %v2160_v44 = vpop.f32.mrb[3].mxu1  ;;  %s3415_s15 = scalar_lea.hbm %s3622_s2, %s2135_s17 }
 0x204   : > { %2100 = vmatmul.mubr.msk.bf16.vlgmr.msra.gmra.mrb[0].mxu0 %vm1234_vm2, %v1069_v43 }
 0x21f   : > { %v1185_v45 = vpop.f32.mrb[4].mxu1 }
 0x220   : > { %v1187_v46 = vpop.f32.mrb[5].mxu1 }
 0x221   : > { %v1189_v47 = vpop.f32.mrb[6].mxu1 }
 0x222   : > { %v1191_v48 = vpop.f32.mrb[7].mxu1 }
 0x2d7   : > { %v1272_v55 = vpop.f32.mrb[0].mxu0 }
 0x2d8   : > { %v1273_v57 = vadd.f32 %v1272_v55, %v1185_v45  ;;  %v1274_v58 = vpop.f32.mrb[1].mxu0 }
 0x2d9   : > { %v1275_v59 = vadd.f32 %v1274_v58, %v1187_v46  ;;  %v1276_v60 = vpop.f32.mrb[2].mxu0  ;;  %v989_v46 = vld [vmem:[%s959_s4] sm:$0xff] }
 0x2da   : > { %v1292_v61 = vadd.f32 %v1285_v54, %v1273_v57  ;;  %v1277_v62 = vadd.f32 %v1276_v60, %v1189_v47  ;;  %v1278_v63 = vpop.f32.mrb[3].mxu0  ;;  %v990_v47 = vld [vmem:[%s959_s4 + $0x8] sm:$0xff]  ;;  %s1694_s4 = scalar_lea.sflag [#allocation4], %s3223_s18 }
 0x2db   : > { %v1279_v1 = vadd.f32 %v1278_v63, %v1191_v48  ;;  %v1293_v9 = vadd.f32 %v1289_v8, %v1275_v59  ;;  %v2110_v48 = vld [vmem:[%s979_s14] ss:$0 sm:$0xff]  ;;  %s3618_s14 = sld [smem:[#allocation42_spill]] }
 0x2dc   : > { %v1304_v2 = vadd.f32 %v1302_v56, %v1292_v61  ;;  %v1294_v3 = vadd.f32 %v1285_v54, %v1277_v62  ;;  %v1334_v23 = vadd.f32 %v1329_v21, %v1292_v61  ;;  %v1505_v21 = vld [vmem:[%s3617_s22 + $0x28] sm:$0xff] }
 0x2dd   : > { %v3325_v11 = vadd.f32 %v1289_v8, %v1279_v1 }
 0x2de   : > { %v2102_v4 = vmul.f32 -1.442695, %v1304_v2  ;;  %v1305_v5 = vadd.f32 %v1303_v0, %v1294_v3  ;;  %v1335_v24 = vadd.f32 %v1331_v22, %v1294_v3  ;;  %v2105_v25 = vmul.f32 -1.442695, %v1334_v23 }
 0x2e0   : > { %2357 = vpow2.f32 %v2102_v4  ;;  %v2103_v7 = vmul.f32 -1.442695, %v1305_v5  ;;  %v2106_v26 = vmul.f32 -1.442695, %v1335_v24 }
 0x2e1   : > { %s973_s24 = scalar_lea.vmem %s3618_s14, %s3263_s12  ;;  %s2635_s14 = scalar_lea.vmem %s2634_s10, 512 }
 0x2e2   : > { %2359 = vpow2.f32 %v2103_v7 }
 0x2e3   : > { %2361 = vtanh.f32 %v1293_v9 }
 0x2ea   : > { %v2358_v10 = vpop.eup %2357 }
 0x2eb   : > { %v1312_v12 = vadd.f32 1.0, %v2358_v10 }
 0x2ec   : > { %v2360_v13 = vpop.eup %2359 }
 0x2ed   : > { %2363 = vrcp.f32 %v1312_v12  ;;  %v1313_v14 = vadd.f32 1.0, %v2360_v13  ;;  %v2362_v15 = vpop.eup %2361  ;;  %v1500_v13 = vld [vmem:[%s3617_s22] sm:$0xff] }
 0x2ee   : > { %2365 = vtanh.f32 %v3325_v11 }
 0x2ef   : > { %2367 = vrcp.f32 %v1313_v14  ;;  %v1501_v14 = vld [vmem:[%s3617_s22 + $0x8] sm:$0xff] }
 0x2f0   : > { %2369 = vpow2.f32 %v2105_v25 }
 0x2f1   : > { %2371 = vpow2.f32 %v2106_v26 }
 0x2f7   : > { %v2364_v16 = vpop.eup %2363 }
 0x2f8   : > { %v2366_v17 = vpop.eup %2365  ;;  %v1360_v18 = vmul.f32 %v2364_v16, %v2362_v15  ;;  %v1502_v15 = vld [vmem:[%s3617_s22 + $0x10] sm:$0xff] }
 0x2f9   : > { %v2368_v19 = vpop.eup %2367 }
 0x2fa   : > { %1364 = vrot.lane.b32.xlu0 %v1360_v18, %s2758_s27  ;;  %v1361_v20 = vmul.f32 %v2368_v19, %v2366_v17  ;;  %v2370_v27 = vpop.eup %2369  ;;  %v2191_v17 = vpack.c.bf16 %v1501_v14, %v1500_v13  ;;  %v1503_v18 = vld [vmem:[%s3617_s22 + $0x18] sm:$0xff] }
 0x2fb   : > { %v2372_v28 = vpop.eup %2371  ;;  %v1342_v29 = vadd.f32 1.0, %v2370_v27  ;;  %v2195_v19 = vpack.c.bf16 %v1503_v18, %v1502_v15 }
 0x2fc   : > { %1366 = vrot.lane.b32.xlu1 %v1361_v20, %s2758_s27  ;;  %v1343_v30 = vadd.f32 1.0, %v2372_v28  ;;  %v1504_v20 = vld [vmem:[%s3617_s22 + $0x20] sm:$0xff]  ;;  %2192 = vmatprep.subr.bf16.mxu0 %v2191_v17 }
 0x2fd   : > { %2373 = vrcp.f32 %v1342_v29  ;;  %2194 = vmatpush3.bf16.msra.mxu0 %v2191_v17  ;;  %v2199_v25 = vpack.c.bf16 %v1505_v21, %v1504_v20 }
 0x2fe   : > { %2375 = vrcp.f32 %v1343_v30  ;;  %2196 = vmatprep.subr.bf16.mxu0 %v2195_v19 }
 0x301   : > { %2198 = vmatpush3.bf16.msra.mxu0 %v2195_v19 }
 0x302   : > { %2200 = vmatprep.subr.bf16.mxu0 %v2199_v25 }
 0x305   : > { %2202 = vmatpush3.bf16.msra.mxu0 %v2199_v25 }
 0x307   : > { %v2374_v32 = vpop.eup %2373 }
 0x308   : > { %v2376_v33 = vpop.eup %2375  ;;  %v1358_v35 = vmul.f32 %v2374_v32, %v1353_v31 }
 0x309   : > { %v1359_v37 = vmul.f32 %v2376_v33, %v1355_v34 }
 0x36c   : > { %v1365_v36 = vpop.permute.xlu0 %1364 }
 0x36d   : > { %v3330_v38 = vadd.f32 %v1365_v36, %v1358_v35 }
 0x36e   : > { %v1367_v39 = vpop.permute.xlu1 %1366 }
 0x36f   : > { %v3332_v40 = vadd.f32 %v1367_v39, %v1359_v37  ;;  %1380 = vrot.lane.b32.xlu0 %v3330_v38, %s2758_s27 }
 0x371   : > { %1382 = vrot.lane.b32.xlu1 %v3332_v40, %s2758_s27 }
 0x3e1   : > { %v1381_v42 = vpop.permute.xlu0 %1380 }
 0x3e2   : > { %v1386_v43 = vmul.f32 %v2107_v41, %v1381_v42 }
 0x3e3   : > { %v1383_v44 = vpop.permute.xlu1 %1382 }
 0x3e4   : > { %v1387_v45 = vmul.f32 %v2107_v41, %v1383_v44  ;;  %1390 = vrot.lane.b32.xlu0 %v1386_v43, %s2758_s27  ;;  %v1506_v43 = vld [vmem:[%s3617_s22 + $0x30] sm:$0xff]  ;;  %v1507_v44 = vld [vmem:[%s3617_s22 + $0x38] sm:$0xff] }
 0x3e6   : > { %1392 = vrot.lane.b32.xlu1 %v1387_v45, %s2758_s27 }
 0x3e8   : > { %1416 = vperm.xlu0 %2319, %v989_v46   ;;  %v2203_v46 = vpack.c.bf16 %v1507_v44, %v1506_v43 }
 0x3ea   : > { %1421 = vperm.xlu1 %2320, %v990_v47   ;;  %2204 = vmatprep.subr.bf16.mxu0 %v2203_v46  ;;  %v1598_v47 = vld [vmem:[#allocation14] sm:$0xff] }
 0x3eb   : > { %2206 = vmatpush3.bf16.msra.mxu0 %v2203_v46 }
 0x3ee   : > { %1441 = vrot.lane.b32.xlu1 %v2110_v48, %s2758_s27  ;;  %v1599_v48 = vld [vmem:[#allocation14 + $0x8] sm:$0xff] }
 0x456   : > { %v1391_v49 = vpop.permute.xlu0 %1390 }
 0x457   : > { %v1396_v52 = vadd.f32 %v1391_v49, %v1293_v9  ;;  %v2207_v49 = vpack.c.bf16 %v1599_v48, %v1598_v47 }
 0x458   : > { %v1393_v53 = vpop.permute.xlu1 %1392 }
 0x459   : > { %v2108_v54 = vmul.f32 -1.442695, %v1396_v52  ;;  %v1397_v55 = vadd.f32 %v1393_v53, %v3325_v11  ;;  %2208 = vmatprep.subr.bf16.mxu0 %v2207_v49  ;;  %v2111_v53 = vld [vmem:[%s973_s24] ss:$0 sm:$0xff] }
 0x45b   : > { %2377 = vpow2.f32 %v2108_v54  ;;  %v2109_v56 = vmul.f32 -1.442695, %v1397_v55 }
 0x45d   : > { %2379 = vpow2.f32 %v2109_v56 }
 0x45e   : > { %2381 = vtanh.f32 %v3330_v38 }
 0x465   : > { %v2378_v57 = vpop.eup %2377 }
 0x466   : > { %v1404_v58 = vadd.f32 1.0, %v2378_v57 }
 0x467   : > { %v2380_v59 = vpop.eup %2379  ;;  %v1417_v63 = vpop.permute.xlu0 %1416 }
 0x468   : > { %2383 = vrcp.f32 %v1404_v58  ;;  %v1405_v60 = vadd.f32 1.0, %v2380_v59  ;;  %v2382_v61 = vpop.eup %2381  ;;  %v2112_v58 = vld [vmem:[%s976_s0] ss:$0 sm:$0xff] }
 0x469   : > { %2385 = vtanh.f32 %v3332_v40  ;;  %v1422_v3 = vpop.permute.xlu1 %1421 }
 0x46a   : > { %2387 = vrcp.f32 %v1405_v60 }
 0x46d   : > { %v1442_v23 = vpop.permute.xlu1 %1441 }
 0x472   : > { %v2384_v62 = vpop.eup %2383 }
 0x473   : > { %v2386_v0 = vpop.eup %2385  ;;  %v1412_v1 = vmul.f32 %v2384_v62, %v2382_v61 }
 0x474   : > { %v2388_v2 = vpop.eup %2387 }
 0x475   : > { %v1424_v4 = vmul.f32 %v1417_v63, %v1412_v1  ;;  %v1413_v5 = vmul.f32 %v2388_v2, %v2386_v0  ;;  %v1600_v2 = vld [vmem:[#allocation14 + $0x10] sm:$0xff] }
 0x477   : > { %v1425_v6 = vmul.f32 %v1422_v3, %v1413_v5  ;;  %v1427_v7 = vsel %vm1426_vm3, %v1424_v4, 0.0 }
 0x479   : > { %v1428_v8 = vsel %vm1426_vm3, %v1425_v6, 0.0 }
 0x47a   : > { %v1429_v9 = vadd.f32 %v1428_v8, %v1427_v7 }
 0x47c   : > { %v1430_v10 = vrot.slane %v1429_v9, 4 }
 0x47e   : > { %v1431_v11 = vadd.f32 %v1430_v10, %v1429_v9 }
 0x480   : > { %v1432_v12 = vrot.slane %v1431_v11, 2 }
 0x482   : > { %v1433_v16 = vadd.f32 %v1432_v12, %v1431_v11 }
 0x484   : > { %v1434_v22 = vrot.slane %v1433_v16, 1 }
 0x486   : > { %v1435_v24 = vadd.f32 %v1434_v22, %v1433_v16 }
 0x488   : > { %v1444_v26 = vmul.f32 %v1442_v23, %v1435_v24 }
 0x48a   : > { %v1448_v27 = vrot.slane %v1444_v26, %v1284_v51 }
 0x48c   : > { %v1450_v28 = vsub.f32 %v1413_v5, %v1448_v27  ;;  %v1449_v29 = vsub.f32 %v1412_v1, %v1448_v27 }
 0x48e   : > { %1474 = vrot.lane.b32.xlu1 %v1450_v28, %s2758_s27  ;;  %v1452_v30 = vmul.f32 %v1450_v28, %v1450_v28  ;;  %1472 = vrot.lane.b32.xlu0 %v1449_v29, %s2758_s27  ;;  %v1451_v31 = vmul.f32 %v1449_v29, %v1449_v29 }
 0x490   : > { %v1454_v32 = vmul.f32 %v1452_v30, %v1422_v3  ;;  %v1453_v33 = vmul.f32 %v1451_v31, %v1417_v63  ;;  %v1601_v3 = vld [vmem:[#allocation14 + $0x18] sm:$0xff] }
 0x491   : > { %v2211_v4 = vpack.c.bf16 %v1601_v3, %v1600_v2 }
 0x492   : > { %v1456_v34 = vsel %vm1426_vm3, %v1454_v32, 0.0  ;;  %v1455_v35 = vsel %vm1426_vm3, %v1453_v33, 0.0 }
 0x493   : > { %v1457_v36 = vadd.f32 %v1456_v34, %v1455_v35 }
 0x495   : > { %v1458_v37 = vrot.slane %v1457_v36, 4 }
 0x497   : > { %v1459_v50 = vadd.f32 %v1458_v37, %v1457_v36 }
 0x499   : > { %v1460_v51 = vrot.slane %v1459_v50, 2 }
 0x49b   : > { %v1461_v39 = vadd.f32 %v1460_v51, %v1459_v50 }
 0x49d   : > { %v1462_v41 = vrot.slane %v1461_v39, 1 }
 0x49f   : > { %v1463_v42 = vadd.f32 %v1462_v41, %v1461_v39 }
 0x4a1   : > { %v1480_v45 = vadd.f32 1e-05, %v1463_v42 }
 0x4a3   : > { %2389 = vrsqrt.f32 %v1480_v45 }
 0x4ad   : > { %v2390_v52 = vpop.eup %2389 }
 0x4ae   : > { %1483 = vrot.lane.b32.xlu0 %v2390_v52, %s2758_s27  ;;  %s947_s27 = scalar_lea.vmem [#allocation16], %s3226_s29 }
 0x4af   : > { %s1712_s9 = sshll.u32 %s947_s27, 4  ;;  %s3407_s9 = int_to_ptr.vmem [resolvable:$true] %s1712_s9 }
 0x4b0   : > { %s2629_s7 = scalar_lea.vmem %s3407_s9, 256  ;;  %p2636_p5 = scmp.lt.s32.totalorder %s3407_s9, %s2634_s10 }
 0x4b1   : > { %p2630_p1 = scmp.ne.s32.totalorder %s3407_s9, %s2629_s7  ;;  %p2637_p6 = scmp.lt.s32.totalorder %s2635_s14, %s2629_s7 }
 0x4b3   : > { %p2631_p12 = pnand %p2630_p1, %p3623_p2  ;;  %p2638_p9 = por %p2637_p6, %p2636_p5 }
 0x4b5   : > { %p2632_p0 = pneg %p2631_p12 }
 0x4b7   : > { %p2639_p4 = pnand %p2638_p9, %p2632_p0 }
 0x500   : > { %v1475_v54 = vpop.permute.xlu1 %1474  ;;  %v1473_v55 = vpop.permute.xlu0 %1472 }
 0x501   : > { %v1479_v56 = vmul.f32 %v2111_v53, %v1475_v54  ;;  %v1478_v57 = vmul.f32 %v2111_v53, %v1473_v55 }
 0x520   : > { %v1484_v59 = vpop.permute.xlu0 %1483 }
 0x521   : > { %v1486_v60 = vmul.f32 %v1484_v59, %v1478_v57  ;;  %v1487_v61 = vmul.f32 %v1484_v59, %v1479_v56 }
 0x523   : > { %v1494_v62 = vadd.f32 %v2112_v58, %v1486_v60  ;;  %v1495_v63 = vadd.f32 %v2112_v58, %v1487_v61 }
 0x525   : > { %v1496_v0 = vsel %vm1234_vm2, %v1494_v62, %v3330_v38  ;;  %v1497_v1 = vsel %vm1234_vm2, %v1495_v63, %v3332_v40  ;;  %2177 = vmatprep.mubr.msk.f32.mxu0 %vm1234_vm2, %v1494_v62  ;;  %v2113_v38 = vld [vmem:[%s3620_s28] ss:$0 sm:$0xff] }
 0x526   : > { %1498 = vst [vmem:[%s947_s27] sm:$0xff] %v1496_v0  ;;  %1499 = vst [vmem:[%s947_s27 + $0x8] sm:$0xff] %v1497_v1  ;;  %2178 = vmatmul.mubr.msk.f32.vlgmr.msra.gmra.mrb[4].mxu0 %vm1234_vm2, %v1495_v63 }
 0x527   : > { %2210 = vmatpush3.bf16.msra.mxu0 %v2207_v49 }
 0x528   : > { %2212 = vmatprep.subr.bf16.mxu0 %v2211_v4 }
 0x52b   : > { %2214 = vmatpush3.bf16.msra.mxu0 %v2211_v4 }
 0x5f9   : > { %v2179_v40 = vpop.f32.mrb[4].mxu0 }
 0x5fa   : > { %v1593_v5 = vadd.f32 %v2179_v40, %v2113_v38  ;;  %v1587_v6 = vpop.f32.mrb[5].mxu0 }
 0x5fb   : > { %v1588_v7 = vadd.f32 %v2113_v38, %v1587_v6 }
 0x5fc   : > { %v1597_v9 = vmax.f32 %v1593_v5, 0.0 }
 0x5fd   : > { %v1596_v8 = vmax.f32 %v1588_v7, 0.0 }
 0x5ff   : > { %2188 = vmatprep.mubr.msk.f32.mxu0 %vm1609_vm4, %v1596_v8 }
 0x600   : > { %2189 = vmatmul.mubr.msk.f32.vlgmr.msra.gmra.mrb[6].mxu0 %vm1609_vm4, %v1597_v9 }
 0x601   : > { %2642 = shalt.err (!%p2639_p4)
}
 0x602   : > { %s2643_s24 = scalar_lea.hbm %s3415_s15, 256  ;;  %s2647_s13 = scalar_lea.hbm %s3622_s2, 512 }
 0x603   : > { %p2644_p10 = scmp.ne.s32.totalorder %s3415_s15, %s2643_s24  ;;  %p2648_p13 = scmp.lt.u32.totalorder %s3415_s15, %s3622_s2 }
 0x604   : > { %p2649_p8 = scmp.lt.u32.totalorder %s2647_s13, %s2643_s24  ;;  %p2651_p1 = scmp.lt.u32.totalorder %s2643_s24, %s3415_s15 }
 0x605   : > { %p2645_p11 = pnand %p2644_p10, %p3623_p2 }
 0x606   : > { %p2650_p3 = por %p2649_p8, %p2648_p13 }
 0x607   : > { %p2646_p7 = pneg %p2645_p11 }
 0x608   : > { %p2652_p12 = por %p2651_p1, %p2650_p3 }
 0x60a   : > { %p2653_p0 = pnand %p2652_p12, %p2646_p7 }
 0x60c   : > { %2656 = shalt.err (!%p2653_p0)
}
 0x60d   : > { %s2760_s12 = smov 128   ;;  %s2761_s3 = smov 8  }
 0x60e   : > { %2237 = dma.vmem_to_hbm [thread:$0]  (%p3623_p2), %s3407_s9, 256, %s3415_s15, %s1694_s4, %s2760_s12, %s2760_s12, %s2761_s3  }
 0x60f   : > { %s3624_s23 = sld [smem:[#allocation47_spill]]  ;;  %s954_s7 = scalar_lea.vmem [#allocation17], %s3226_s29 }
 0x610   : > { %s1728_s20 = sshll.u32 %s954_s7, 4  ;;  %s3625_s24 = sld [smem:[#allocation49_spill]]  ;;  %s3448_s20 = int_to_ptr.vmem [resolvable:$true] %s1728_s20 }
 0x611   : > { %s1699_s15 = scalar_lea.sflag [#allocation18], %s3223_s18  ;;  %s2657_s29 = scalar_lea.vmem %s3448_s20, 256 }
 0x612   : > { %p2658_p5 = scmp.ne.s32.totalorder %s3448_s20, %s2657_s29  ;;  %s2762_s4 = smov [#allocation17]  }
 0x613   : > { %s2661_s19 = sshll.u32 %s2762_s4, 4  ;;  %s2662_s19 = int_to_ptr.vmem [resolvable:$false] %s2661_s19 }
 0x614   : > { %p2659_p6 = pnand %p2658_p5, %p3623_p2  ;;  %s2663_s25 = scalar_lea.vmem %s2662_s19, 512 }
 0x615   : > { %v2116_v10 = vld [vmem:[%s3624_s23] ss:$0 sm:$0xff]  ;;  %p2664_p4 = scmp.lt.s32.totalorder %s3448_s20, %s2662_s19  ;;  %p2665_p10 = scmp.lt.s32.totalorder %s2663_s25, %s2657_s29 }
 0x616   : > { %s3455_s9 = scalar_lea.hbm %s3625_s24, %s2135_s17  ;;  %p2660_p9 = pneg %p2659_p6 }
 0x617   : > { %p2666_p11 = por %p2665_p10, %p2664_p4 }
 0x619   : > { %p2667_p7 = pnand %p2666_p11, %p2660_p9 }
 0x6d3   : > { %v2190_v11 = vpop.f32.mrb[6].mxu0 }
 0x6d4   : > { %v1688_v12 = vadd.f32 %v2190_v11, %v2116_v10  ;;  %v1682_v13 = vpop.f32.mrb[7].mxu0 }
 0x6d5   : > { %v1683_v14 = vadd.f32 %v2116_v10, %v1682_v13 }
 0x6d6   : > { %1692 = vst [vmem:[%s954_s7 + $0x8] sm:$0xff] %v1688_v12 }
 0x6d7   : > { %1691 = vst [vmem:[%s954_s7] sm:$0xff] %v1683_v14 }
 0x6d8   : > { %2670 = shalt.err (!%p2667_p7)
}
 0x6d9   : > { %s2671_s26 = scalar_lea.hbm %s3455_s9, 256  ;;  %s2675_s0 = scalar_lea.hbm %s3625_s24, 512 }
 0x6da   : > { %p2672_p13 = scmp.ne.s32.totalorder %s3455_s9, %s2671_s26  ;;  %p2676_p1 = scmp.lt.u32.totalorder %s3455_s9, %s3625_s24 }
 0x6db   : > { %p2677_p12 = scmp.lt.u32.totalorder %s2675_s0, %s2671_s26  ;;  %p2679_p5 = scmp.lt.u32.totalorder %s2671_s26, %s3455_s9 }
 0x6dc   : > { %p2673_p8 = pnand %p2672_p13, %p3623_p2 }
 0x6dd   : > { %p2678_p0 = por %p2677_p12, %p2676_p1 }
 0x6de   : > { %p2674_p3 = pneg %p2673_p8 }
 0x6df   : > { %p2680_p6 = por %p2679_p5, %p2678_p0 }
 0x6e1   : > { %p2681_p9 = pnand %p2680_p6, %p2674_p3 }
 0x6e3   : > { %2684 = shalt.err (!%p2681_p9)
}
 0x6e4   : > { %2238 = dma.vmem_to_hbm [thread:$0]  (%p3623_p2), %s3448_s20, 256, %s3455_s9, %s1699_s15, %s2760_s12, %s2760_s12, %s2761_s3  }
 0x6e5 PF: > { %s3626_s1 = sld [smem:[#allocation26_spill]]  ;;  %s3627_s23 = sld [smem:[#allocation32_spill]] }
 0x6e6   : > { %p3629_p10 = scmp.ge.s32.totalorder %s2743_s21, 2 }
 0x6eb   : > { %s1743_s7 = sand.u32 1, %s3626_s1   ;;  %p3628_p4 = scmp.ne.s32.totalorder %s3627_s23, 0 }
 0x6ec   : > { %s1744_s10 = scalar_lea.sflag [#allocation4], %s1743_s7 }
 0x6ed   : > { %p2268_p11 = pnand %p3629_p10, %p3628_p4 }
 0x6ef   : > { %2722 = dma.done.wait (!%p2268_p11), %s1744_s10, 256  }
 0x6f0   : > { %2724 = vsyncadd (!%p2268_p11), %s1744_s10, 4294967040  ;;  %s1753_s5 = scalar_lea.sflag [#allocation18], %s1743_s7 }
 0x6f1   : > { %2726 = dma.done.wait (!%p2268_p11), %s1753_s5, 256  }
 0x6f2   : > { %2728 = vsyncadd (!%p2268_p11), %s1753_s5, 4294967040  ;;  %s3630_s21 = sld [smem:[#allocation28_spill]]  ;;  %s3631_s18 = sld [smem:[#allocation27_spill]] }
 0x6f3   : > { %s3632_s20 = sld [smem:[#allocation29_spill]]  ;;  %s3633_s0 = smov %s2735_s30 }
 0x6f8   : > { %p46_p2 = scmp.ge.s32.totalorder %s3630_s21, 4   ;;  %s3634_s30 = smov %s3631_s18 }
 0x6fa   :  { %48 = sbr.rel (!%p46_p2) target bundleno = 32 (0x20), region = 251 }
 0x701   :  { %1758 = vsyncpa [#allocation3], 1 }
 0x702   :  { %1760 = vsyncpa [#allocation3 + $0x1], 1 }
 0x703   :  { %1761 = vsyncpa [#allocation6], 1 }
 0x704   :  { %1763 = vsyncpa [#allocation6 + $0x1], 1 }
 0x705   :  { %1764 = vsyncpa [#allocation9], 1 }
 0x706   :  { %1766 = vsyncpa [#allocation9 + $0x1], 1 }
 0x707   :  { %1767 = vsyncpa [#allocation12], 1 }
 0x708   :  { %1769 = vsyncpa [#allocation12 + $0x1], 1 }
 0x709   :  { %1770 = vsyncpa [#allocation15], 1 }
 0x70a   :  { %1771 = vsyncpa [#allocation4], 1 }
 0x70b   :  { %1773 = vsyncpa [#allocation4 + $0x1], 1 }
 0x70c   :  { %1774 = vsyncpa [#allocation18], 1 }
 0x70d   :  { %1776 = vsyncpa [#allocation18 + $0x1], 1 }

</bundles_post_ra>
